<compile_context>
chip_gen: v7x
topology: tpu7x:2x2x1
jax: 0.10.0
libtpu: 0.0.40
codegen_flags: <defaults>
</compile_context>

<pallas_src>
import functools

import jax
import jax.numpy as jnp
import numpy as np
from jax import lax
from jax.experimental import pallas as pl
from jax.experimental.pallas import tpu as pltpu

EPS = 1e-5
LANE = 128
C1_PAD = 1e4          # exp(-C1_PAD) == 0.0 in f32 -> masks padded rows/cols exactly


def _round_up(x, m):
    return ((x + m - 1) // m) * m


def _dot_t(a, b):
    # a @ b.T (contract last dim of both), f32 accumulation on the MXU
    return lax.dot_general(a, b, (((1,), (1,)), ((), ())),
                           preferred_element_type=jnp.float32)


def _dot(a, b):
    return lax.dot_general(a, b, (((1,), (0,)), ((), ())),
                           preferred_element_type=jnp.float32)


def gw_kernel(nh,
              e1n_hbm, e2n_hbm, transb_hbm, costtb_hbm,
              mus_ref, f2_ref, c1_ref, transf_ref,
              out_ref,
              e1n_sc, e2n_sc, transb_sc, costtb_sc,
              gw_row, w_row, reg_row, load_sem):
    c = pl.program_id(0)            # per-TensorCore split ("parallel")
    i = pl.program_id(1)            # row-block axis ("arbitrary", carries accumulators)
    nsteps = pl.num_programs(1)
    tm = c1_ref.shape[0]            # source row-block size

    # ---- once per core: single-buffered resident loads + accumulator reset ----
    @pl.when(i == 0)
    def _init():
        copies = [
            pltpu.make_async_copy(e1n_hbm, e1n_sc, load_sem.at[0]),
            pltpu.make_async_copy(e2n_hbm, e2n_sc, load_sem.at[1]),
            pltpu.make_async_copy(transb_hbm, transb_sc, load_sem.at[2]),
            pltpu.make_async_copy(costtb_hbm, costtb_sc, load_sem.at[3]),
        ]
        for cp in copies:
            cp.start()
        for cp in copies:
            cp.wait()
        gw_row[...] = jnp.zeros_like(gw_row)
        w_row[...] = jnp.zeros_like(w_row)
        reg_row[...] = jnp.zeros_like(reg_row)

    # ---- every step: one (tm, :) row block of the source ----
    row0 = pl.multiple_of((c * nh + i) * tm, tm)
    e1n_blk = e1n_sc[pl.ds(row0, tm), :]                            # (tm, dp) bf16

    # bf16 Gram matmuls (f32 accumulate) -> exp on the EUP slot (kept f32 for
    # v5e compatibility; v6e/v7x could use the bf16 EUP path).
    cost_s = 1.0 - jnp.exp(-5.0 * (1.0 - _dot_t(e1n_blk, e1n_sc[...])))   # (tm, n_sp)
    cost_st = 1.0 - jnp.exp(-(1.0 - _dot_t(e1n_blk, e2n_sc[...])))        # (tm, n_tp)

    # f1[r] = sum_k cost_s[r,k]^2 * mu_s[k]  (lane reduce; mu_s is a zero-padded row)
    f1 = jnp.sum(cost_s * cost_s * mus_ref[...], axis=1, keepdims=True)   # (tm, 1)

    # cost = f1 + f2 - 2 * cost_s @ trans @ cost_t^T
    # both O(tm*N^2) matmuls run bf16-in / f32-accumulate on the MXU.
    a_blk = _dot(cost_s.astype(jnp.bfloat16), transb_sc[...])             # (tm, n_tp)
    m_blk = _dot_t(a_blk.astype(jnp.bfloat16), costtb_sc[...])            # (tm, n_tp)
    cost_blk = (f1 + f2_ref[...]) - 2.0 * m_blk                           # f32

    trans_blk = transf_ref[...]                                           # (tm, n_tp) f32
    c1_blk = c1_ref[...]                                                  # (tm, n_sp) f32

    # lane-shaped partial accumulators: sublane reduce per step, one cross-lane
    # reduce only at finalize.
    gw_row[...] += jnp.sum(cost_blk * trans_blk, axis=0, keepdims=True)
    w_row[...] += jnp.sum(cost_st * trans_blk, axis=0, keepdims=True)
    # exp(-cost1) computed in-kernel: padded region of cost1 is C1_PAD, so the
    # exp underflows to exactly 0 and masks the padding.
    reg_row[...] += jnp.sum((cost_s - c1_blk) ** 2 * jnp.exp(-c1_blk),
                            axis=0, keepdims=True)

    # ---- last step of this core: pack the three scalars into one lane-dense block ----
    @pl.when(i == nsteps - 1)
    def _fin():
        lane = lax.broadcasted_iota(jnp.int32, (1, 8, LANE), 2)
        out_ref[...] = (jnp.where(lane == 0, jnp.sum(gw_row[...]), 0.0) +
                        jnp.where(lane == 1, jnp.sum(w_row[...]), 0.0) +
                        jnp.where(lane == 2, jnp.sum(reg_row[...]), 0.0))


class GromovWassersteinEmbedding:
    """JAX/Pallas port of the PyTorch module (cosine cost, L2 loss)."""

    def __init__(self, num1, num2, dim, key, cost_type='cosine', loss_type='L2'):
        assert cost_type == 'cosine' and loss_type == 'L2'
        # TODO(synk): the 'kkl' loss / non-cosine cost branches and the
        #             prior/mask1/mask2/mask12 arguments are not implemented
        #             (default path only).
        k1, k2 = jax.random.split(key)
        self.dim = dim
        self.emb1 = jax.random.uniform(k1, (num1, dim), jnp.float32,
                                       -1.0 / dim, 1.0 / dim)
        self.emb2 = jax.random.uniform(k2, (num2, dim), jnp.float32,
                                       -1.0 / dim, 1.0 / dim)
        # generation-aware VMEM budget (64 MiB/TC on v7x, 128 MiB on v5e/v6e)
        try:
            cap = int(pltpu.get_tpu_info().vmem_capacity_bytes)
            self._vmem_cap = cap if cap >= (16 << 20) else (64 << 20)
        except Exception:
            self._vmem_cap = 64 << 20

    @functools.partial(jax.jit, static_argnums=0)
    def forward(self, index1, index2, trans, mu_s, mu_t, cost1, cost2):
        # ---------------- plain-XLA glue & target-side precompute ----------------
        e1 = jnp.take(self.emb1, index1, axis=0)          # (n_s, dim)
        e2 = jnp.take(self.emb2, index2, axis=0)          # (n_t, dim)
        n_s, n_t, dim = e1.shape[0], e2.shape[0], self.dim

        # pre-normalized embeddings fold the cosine denominator into the Grams.
        # (EPS placement rsqrt(|e|^2+eps) vs (|ei||ej|+eps) in the reference:
        #  negligible for non-degenerate embeddings.)
        e1n = e1 * lax.rsqrt(jnp.sum(e1 * e1, axis=1, keepdims=True) + EPS)
        e2n = e2 * lax.rsqrt(jnp.sum(e2 * e2, axis=1, keepdims=True) + EPS)

        # target-side precompute hoisted out of the (serialized) kernel prologue
        en2 = jnp.sqrt(jnp.sum(e2 * e2, axis=1, keepdims=True))
        cost_t = 1.0 - jnp.exp(-5.0 * (1.0 - (e2 @ e2.T) / (en2 @ en2.T + EPS)))
        f2 = jnp.matmul(mu_t.T, (cost_t ** 2).T)          # (1, n_t)
        reg_pre = jnp.sum((cost_t - cost2) ** 2 * jnp.exp(-cost2))
        eye = jnp.eye(dim, dtype=jnp.float32)
        reg_pre += jnp.sum((e1.T @ e1 - eye) ** 2) + jnp.sum((e2.T @ e2 - eye) ** 2)

        # ---------------- pad to lane-dense (multiple-of-128) shapes ----------------
        n_sp = _round_up(n_s, LANE)
        n_tp = _round_up(n_t, LANE)
        dp = _round_up(dim, LANE)

        def pad2(x, r, c, fill=0.0, dtype=jnp.float32):
            return jnp.full((r, c), fill, dtype).at[:x.shape[0], :x.shape[1]].set(
                x.astype(dtype))

        e1n_p = pad2(e1n, n_sp, dp, dtype=jnp.bfloat16)           # resident (MXU)
        e2n_p = pad2(e2n, n_tp, dp, dtype=jnp.bfloat16)           # resident (MXU)
        transb_p = pad2(trans, n_sp, n_tp, dtype=jnp.bfloat16)    # resident (MXU)
        costtb_p = pad2(cost_t, n_tp, n_tp, dtype=jnp.bfloat16)   # resident (MXU)
        transf_p = pad2(trans, n_sp, n_tp)                        # f32 rows (reductions)
        c1_p = pad2(cost1, n_sp, n_sp, fill=C1_PAD)               # exp(-pad)=0 mask
        mus_row = jnp.zeros((1, n_sp), jnp.float32).at[0, :n_s].set(mu_s[:, 0])
        f2_row = jnp.zeros((1, n_tp), jnp.float32).at[:, :n_t].set(f2)

        # ---------------- tiling / VMEM budget (generation-aware) ----------------
        def vmem_est(tm):
            bf, f4 = 2, 4
            resident = bf * (n_sp * dp + n_tp * dp + n_sp * n_tp + n_tp * n_tp)
            accs = f4 * (2 * n_tp + n_sp)
            small = 2 * f4 * (n_sp + n_tp) + 2 * f4 * 8 * LANE    # small rows + output
            streams = 2 * f4 * (tm * n_sp + tm * n_tp)            # double-buffered rows
            temps = f4 * (3 * tm * n_sp + 4 * tm * n_tp) + bf * (tm * n_sp + tm * n_tp)
            return resident + accs + small + streams + temps

        budget = int(0.85 * self._vmem_cap)
        tm_max = 512 if self._vmem_cap >= (96 << 20) else 256
        tm = 128
        for cand in (512, 256):
            if cand <= tm_max and n_sp % cand == 0 and int(1.2 * vmem_est(cand)) <= budget:
                tm = cand
                break
        nsteps = n_sp // tm
        n_cores = 2 if (nsteps % 2 == 0 and nsteps >= 2) else 1   # v7x megacore split
        nh = nsteps // n_cores

        vmem_limit = int(min(int(0.95 * self._vmem_cap),
                             max(32 << 20, int(1.5 * vmem_est(tm)))))

        row_map = lambda c, i: (c * nh + i, 0)
        const_map = lambda c, i: (0, 0)

        grid_spec = pltpu.PrefetchScalarGridSpec(
            num_scalar_prefetch=0,
            grid=(n_cores, nh),
            in_specs=[
                pl.BlockSpec(memory_space=pl.ANY),        # e1n  (bf16, resident)
                pl.BlockSpec(memory_space=pl.ANY),        # e2n  (bf16, resident)
                pl.BlockSpec(memory_space=pl.ANY),        # trans bf16 (resident)
                pl.BlockSpec(memory_space=pl.ANY),        # cost_t bf16 (resident)
                pl.BlockSpec((1, n_sp), const_map),       # mu_s row
                pl.BlockSpec((1, n_tp), const_map),       # f2 row
                pl.BlockSpec((tm, n_sp), row_map),        # cost1 rows (pipelined)
                pl.BlockSpec((tm, n_tp), row_map),        # trans f32 rows (pipelined)
            ],
            out_specs=pl.BlockSpec((1, 8, LANE), lambda c, i: (c, 0, 0)),
            scratch_shapes=[
                pltpu.VMEM((n_sp, dp), jnp.bfloat16),     # resident e1n
                pltpu.VMEM((n_tp, dp), jnp.bfloat16),     # resident e2n
                pltpu.VMEM((n_sp, n_tp), jnp.bfloat16),   # resident trans (MXU operand)
                pltpu.VMEM((n_tp, n_tp), jnp.bfloat16),   # resident cost_t (MXU operand)
                pltpu.VMEM((1, n_tp), jnp.float32),       # d_gw lane accumulator
                pltpu.VMEM((1, n_tp), jnp.float32),       # d_w lane accumulator
                pltpu.VMEM((1, n_sp), jnp.float32),       # reg lane accumulator
                pltpu.SemaphoreType.DMA((4,)),            # resident-load semaphores
            ],
        )

        out = pl.pallas_call(
            functools.partial(gw_kernel, nh),
            out_shape=jax.ShapeDtypeStruct((n_cores, 8, LANE), jnp.float32),
            grid_spec=grid_spec,
            compiler_params=pltpu.CompilerParams(
                dimension_semantics=("parallel", "arbitrary"),
                vmem_limit_bytes=vmem_limit,
            ),
        )(e1n_p, e2n_p, transb_p, costtb_p, mus_row, f2_row, c1_p, transf_p)

        sums = jnp.sum(out[:, 0, :], axis=0)              # sum the per-core rows
        return sums[0], sums[1], sums[2] + reg_pre

    # pure-JAX reference (mirrors the PyTorch module, full f32) for validation
    def forward_ref(self, index1, index2, trans, mu_s, mu_t, cost1, cost2):
        e1 = self.emb1[index1]
        e2 = self.emb2[index2]

        def self_cost(e):
            en = jnp.sqrt(jnp.sum(e ** 2, axis=1, keepdims=True))
            return 1 - jnp.exp(-5 * (1 - (e @ e.T) / (en @ en.T + EPS)))

        cost_s = self_cost(e1)
        cost_t = self_cost(e2)
        en1 = jnp.sqrt(jnp.sum(e1 ** 2, axis=1, keepdims=True))
        en2 = jnp.sqrt(jnp.sum(e2 ** 2, axis=1, keepdims=True))
        cost_st = 1 - jnp.exp(-(1 - (e1 @ e2.T) / (en1 @ en2.T + EPS)))

        f1 = (cost_s ** 2) @ mu_s                      # (n_s,1)
        f2 = mu_t.T @ (cost_t ** 2).T                  # (1,n_t)
        cost = (f1 + f2) - 2 * (cost_s @ trans @ cost_t.T)

        d_gw = jnp.sum(cost * trans)
        d_w = jnp.sum(cost_st * trans)
        reg = jnp.sum((cost_s - cost1) ** 2 * jnp.exp(-cost1))
        reg += jnp.sum((cost_t - cost2) ** 2 * jnp.exp(-cost2))
        eye = jnp.eye(self.dim, dtype=jnp.float32)
        reg += jnp.sum((e1.T @ e1 - eye) ** 2) + jnp.sum((e2.T @ e2 - eye) ** 2)
        return d_gw, d_w, reg


if __name__ == "__main__":
    key = jax.random.PRNGKey(0)
    k_model, k_i1, k_i2, k_tr, k_ms, k_mt, k_c1, k_c2 = jax.random.split(key, 8)

    num1, num2, dim = 50, 60, 32     # embedding table sizes / hidden dim
    n_s, n_t = 16, 24                # batch of source / target indices

    model = GromovWassersteinEmbedding(num1, num2, dim, k_model)

    index1 = jax.random.randint(k_i1, (n_s,), 0, num1)
    index2 = jax.random.randint(k_i2, (n_t,), 0, num2)
    trans = jax.random.uniform(k_tr, (n_s, n_t), jnp.float32)
    trans = trans / jnp.sum(trans)
    mu_s = jax.random.uniform(k_ms, (n_s, 1), jnp.float32)
    mu_s = mu_s / jnp.sum(mu_s)
    mu_t = jax.random.uniform(k_mt, (n_t, 1), jnp.float32)
    mu_t = mu_t / jnp.sum(mu_t)
    cost1 = jax.random.uniform(k_c1, (n_s, n_s), jnp.float32)
    cost2 = jax.random.uniform(k_c2, (n_t, n_t), jnp.float32)

    d_gw, d_w, reg = model.forward(index1, index2, trans, mu_s, mu_t, cost1, cost2)
    jax.block_until_ready((d_gw, d_w, reg))

    r_gw, r_w, r_reg = model.forward_ref(index1, index2, trans, mu_s, mu_t,
                                         cost1, cost2)
    # bf16 MXU path (f32 accumulate) introduces ~1e-3-scale absolute error.
    np.testing.assert_allclose(np.array(d_gw), np.array(r_gw), rtol=2e-2, atol=5e-3)
    np.testing.assert_allclose(np.array(d_w), np.array(r_w), rtol=2e-2, atol=5e-3)
    np.testing.assert_allclose(np.array(reg), np.array(r_reg), rtol=2e-2, atol=5e-3)

    print("KERNEL_OK")
</pallas_src>

<mosaic_0001>
module attributes {stable_mosaic.version = 11 : i64} {
  func.func @gw_kernel(%arg0: i32, %arg1: i32, %arg2: memref<128x128xbf16, #tpu.memory_space<any>>, %arg3: memref<128x128xbf16, #tpu.memory_space<any>>, %arg4: memref<128x128xbf16, #tpu.memory_space<any>>, %arg5: memref<128x128xbf16, #tpu.memory_space<any>>, %arg6: memref<1x128xf32, #tpu.memory_space<vmem>>, %arg7: memref<1x128xf32, #tpu.memory_space<vmem>>, %arg8: memref<128x128xf32, #tpu.memory_space<vmem>>, %arg9: memref<128x128xf32, #tpu.memory_space<vmem>>, %arg10: memref<1x8x128xf32, #tpu.memory_space<vmem>>, %arg11: memref<128x128xbf16, #tpu.memory_space<vmem>>, %arg12: memref<128x128xbf16, #tpu.memory_space<vmem>>, %arg13: memref<128x128xbf16, #tpu.memory_space<vmem>>, %arg14: memref<128x128xbf16, #tpu.memory_space<vmem>>, %arg15: memref<1x128xf32, #tpu.memory_space<vmem>>, %arg16: memref<1x128xf32, #tpu.memory_space<vmem>>, %arg17: memref<1x128xf32, #tpu.memory_space<vmem>>, %arg18: memref<4x!tpu.dma_semaphore, #tpu.memory_space<semaphore_mem>>) attributes {dimension_semantics = [#tpu.dimension_semantics<parallel>, #tpu.dimension_semantics<arbitrary>], iteration_bounds = array<i64: 1, 1>, scalar_prefetch = 0 : i64, scratch_operands = 8 : i64, tpu.core_type = #tpu.core_type<tc>, window_params = [{}, {}, {}, {}, {pipeline_mode = #tpu.pipeline_mode<synchronous>, transform_indices = @transform_4, window_bounds = array<i64: 1, 128>}, {pipeline_mode = #tpu.pipeline_mode<synchronous>, transform_indices = @transform_5, window_bounds = array<i64: 1, 128>}, {transform_indices = @transform_6, window_bounds = array<i64: 128, 128>}, {transform_indices = @transform_7, window_bounds = array<i64: 128, 128>}, {transform_indices = @transform_8, window_bounds = array<i64: 1, 8, 128>}]} {
    %c0_i32 = arith.constant 0 : i32
    %0 = arith.cmpi eq, %arg1, %c0_i32 : i32
    %1 = arith.extui %0 : i1 to i32
    %c0_i32_0 = arith.constant 0 : i32
    %2 = arith.cmpi ne, %1, %c0_i32_0 : i32
    scf.if %2 {
      %c0_i32_46 = arith.constant 0 : i32
      %74 = tpu.memref_slice %arg18[%c0_i32_46] : memref<4x!tpu.dma_semaphore, #tpu.memory_space<semaphore_mem>> -> memref<1x!tpu.dma_semaphore, #tpu.memory_space<semaphore_mem>>
      %75 = tpu.memref_squeeze %74 : memref<1x!tpu.dma_semaphore, #tpu.memory_space<semaphore_mem>> -> memref<!tpu.dma_semaphore, #tpu.memory_space<semaphore_mem>>
      tpu.enqueue_dma source(%arg2 : memref<128x128xbf16, #tpu.memory_space<any>>) target(%arg11 : memref<128x128xbf16, #tpu.memory_space<vmem>>) target_semaphore(%75 : memref<!tpu.dma_semaphore, #tpu.memory_space<semaphore_mem>>)
      %c1_i32_47 = arith.constant 1 : i32
      %76 = tpu.memref_slice %arg18[%c1_i32_47] : memref<4x!tpu.dma_semaphore, #tpu.memory_space<semaphore_mem>> -> memref<1x!tpu.dma_semaphore, #tpu.memory_space<semaphore_mem>>
      %77 = tpu.memref_squeeze %76 : memref<1x!tpu.dma_semaphore, #tpu.memory_space<semaphore_mem>> -> memref<!tpu.dma_semaphore, #tpu.memory_space<semaphore_mem>>
      tpu.enqueue_dma source(%arg3 : memref<128x128xbf16, #tpu.memory_space<any>>) target(%arg12 : memref<128x128xbf16, #tpu.memory_space<vmem>>) target_semaphore(%77 : memref<!tpu.dma_semaphore, #tpu.memory_space<semaphore_mem>>)
      %c2_i32 = arith.constant 2 : i32
      %78 = tpu.memref_slice %arg18[%c2_i32] : memref<4x!tpu.dma_semaphore, #tpu.memory_space<semaphore_mem>> -> memref<1x!tpu.dma_semaphore, #tpu.memory_space<semaphore_mem>>
      %79 = tpu.memref_squeeze %78 : memref<1x!tpu.dma_semaphore, #tpu.memory_space<semaphore_mem>> -> memref<!tpu.dma_semaphore, #tpu.memory_space<semaphore_mem>>
      tpu.enqueue_dma source(%arg4 : memref<128x128xbf16, #tpu.memory_space<any>>) target(%arg13 : memref<128x128xbf16, #tpu.memory_space<vmem>>) target_semaphore(%79 : memref<!tpu.dma_semaphore, #tpu.memory_space<semaphore_mem>>)
      %c3_i32 = arith.constant 3 : i32
      %80 = tpu.memref_slice %arg18[%c3_i32] : memref<4x!tpu.dma_semaphore, #tpu.memory_space<semaphore_mem>> -> memref<1x!tpu.dma_semaphore, #tpu.memory_space<semaphore_mem>>
      %81 = tpu.memref_squeeze %80 : memref<1x!tpu.dma_semaphore, #tpu.memory_space<semaphore_mem>> -> memref<!tpu.dma_semaphore, #tpu.memory_space<semaphore_mem>>
      tpu.enqueue_dma source(%arg5 : memref<128x128xbf16, #tpu.memory_space<any>>) target(%arg14 : memref<128x128xbf16, #tpu.memory_space<vmem>>) target_semaphore(%81 : memref<!tpu.dma_semaphore, #tpu.memory_space<semaphore_mem>>)
      %c0_i32_48 = arith.constant 0 : i32
      %82 = tpu.memref_slice %arg18[%c0_i32_48] : memref<4x!tpu.dma_semaphore, #tpu.memory_space<semaphore_mem>> -> memref<1x!tpu.dma_semaphore, #tpu.memory_space<semaphore_mem>>
      %83 = tpu.memref_squeeze %82 : memref<1x!tpu.dma_semaphore, #tpu.memory_space<semaphore_mem>> -> memref<!tpu.dma_semaphore, #tpu.memory_space<semaphore_mem>>
      tpu.wait_dma2 semaphore(%83 : memref<!tpu.dma_semaphore, #tpu.memory_space<semaphore_mem>>) src(%arg2 : memref<128x128xbf16, #tpu.memory_space<any>>) dst(%arg11 : memref<128x128xbf16, #tpu.memory_space<vmem>>)
      %c1_i32_49 = arith.constant 1 : i32
      %84 = tpu.memref_slice %arg18[%c1_i32_49] : memref<4x!tpu.dma_semaphore, #tpu.memory_space<semaphore_mem>> -> memref<1x!tpu.dma_semaphore, #tpu.memory_space<semaphore_mem>>
      %85 = tpu.memref_squeeze %84 : memref<1x!tpu.dma_semaphore, #tpu.memory_space<semaphore_mem>> -> memref<!tpu.dma_semaphore, #tpu.memory_space<semaphore_mem>>
      tpu.wait_dma2 semaphore(%85 : memref<!tpu.dma_semaphore, #tpu.memory_space<semaphore_mem>>) src(%arg3 : memref<128x128xbf16, #tpu.memory_space<any>>) dst(%arg12 : memref<128x128xbf16, #tpu.memory_space<vmem>>)
      %c2_i32_50 = arith.constant 2 : i32
      %86 = tpu.memref_slice %arg18[%c2_i32_50] : memref<4x!tpu.dma_semaphore, #tpu.memory_space<semaphore_mem>> -> memref<1x!tpu.dma_semaphore, #tpu.memory_space<semaphore_mem>>
      %87 = tpu.memref_squeeze %86 : memref<1x!tpu.dma_semaphore, #tpu.memory_space<semaphore_mem>> -> memref<!tpu.dma_semaphore, #tpu.memory_space<semaphore_mem>>
      tpu.wait_dma2 semaphore(%87 : memref<!tpu.dma_semaphore, #tpu.memory_space<semaphore_mem>>) src(%arg4 : memref<128x128xbf16, #tpu.memory_space<any>>) dst(%arg13 : memref<128x128xbf16, #tpu.memory_space<vmem>>)
      %c3_i32_51 = arith.constant 3 : i32
      %88 = tpu.memref_slice %arg18[%c3_i32_51] : memref<4x!tpu.dma_semaphore, #tpu.memory_space<semaphore_mem>> -> memref<1x!tpu.dma_semaphore, #tpu.memory_space<semaphore_mem>>
      %89 = tpu.memref_squeeze %88 : memref<1x!tpu.dma_semaphore, #tpu.memory_space<semaphore_mem>> -> memref<!tpu.dma_semaphore, #tpu.memory_space<semaphore_mem>>
      tpu.wait_dma2 semaphore(%89 : memref<!tpu.dma_semaphore, #tpu.memory_space<semaphore_mem>>) src(%arg5 : memref<128x128xbf16, #tpu.memory_space<any>>) dst(%arg14 : memref<128x128xbf16, #tpu.memory_space<vmem>>)
      %cst_52 = arith.constant 0.000000e+00 : f32
      %90 = vector.broadcast %cst_52 : f32 to vector<1x128xf32>
      %c0_53 = arith.constant 0 : index
      %c0_54 = arith.constant 0 : index
      %91 = vector.load %arg15[%c0_53, %c0_54] : memref<1x128xf32, #tpu.memory_space<vmem>>, vector<1x128xf32>
      tpu.vector_store %arg15[%c0_53, %c0_54], %90 {strides = array<i32>} : memref<1x128xf32, #tpu.memory_space<vmem>>, vector<1x128xf32>,
      %cst_55 = arith.constant 0.000000e+00 : f32
      %92 = vector.broadcast %cst_55 : f32 to vector<1x128xf32>
      %c0_56 = arith.constant 0 : index
      %c0_57 = arith.constant 0 : index
      %93 = vector.load %arg16[%c0_56, %c0_57] : memref<1x128xf32, #tpu.memory_space<vmem>>, vector<1x128xf32>
      tpu.vector_store %arg16[%c0_56, %c0_57], %92 {strides = array<i32>} : memref<1x128xf32, #tpu.memory_space<vmem>>, vector<1x128xf32>,
      %cst_58 = arith.constant 0.000000e+00 : f32
      %94 = vector.broadcast %cst_58 : f32 to vector<1x128xf32>
      %c0_59 = arith.constant 0 : index
      %c0_60 = arith.constant 0 : index
      %95 = vector.load %arg17[%c0_59, %c0_60] : memref<1x128xf32, #tpu.memory_space<vmem>>, vector<1x128xf32>
      tpu.vector_store %arg17[%c0_59, %c0_60], %94 {strides = array<i32>} : memref<1x128xf32, #tpu.memory_space<vmem>>, vector<1x128xf32>,
    } else {
    }
    %c1_i32 = arith.constant 1 : i32
    %3 = arith.muli %arg0, %c1_i32 : i32
    %4 = arith.addi %3, %arg1 : i32
    %c128_i32 = arith.constant 128 : i32
    %5 = arith.muli %4, %c128_i32 : i32
    %6 = tpu.assume_multiple %5, 128 : i32
    %7 = arith.index_cast %6 : i32 to index
    %c0 = arith.constant 0 : index
    %8 = vector.load %arg11[%7, %c0] : memref<128x128xbf16, #tpu.memory_space<vmem>>, vector<128x128xbf16>
    %c0_1 = arith.constant 0 : index
    %c0_2 = arith.constant 0 : index
    %9 = vector.load %arg11[%c0_1, %c0_2] : memref<128x128xbf16, #tpu.memory_space<vmem>>, vector<128x128xbf16>
    %cst = arith.constant dense<0.000000e+00> : vector<128x128xf32>
    %10 = tpu.matmul %8, %9, %cst {dimension_numbers = #tpu.dot_dimension_numbers<[1], [1], [0], [0], [0, 0, 1, 0], [], []>} : vector<128x128xbf16>, vector<128x128xbf16>, vector<128x128xf32> -> vector<128x128xf32>
    %cst_3 = arith.constant 1.000000e+00 : f32
    %11 = vector.broadcast %cst_3 : f32 to vector<128x128xf32>
    %12 = arith.subf %11, %10 : vector<128x128xf32>
    %cst_4 = arith.constant -5.000000e+00 : f32
    %13 = vector.broadcast %cst_4 : f32 to vector<128x128xf32>
    %14 = arith.mulf %13, %12 : vector<128x128xf32>
    %15 = math.exp %14 : vector<128x128xf32>
    %cst_5 = arith.constant 1.000000e+00 : f32
    %16 = vector.broadcast %cst_5 : f32 to vector<128x128xf32>
    %17 = arith.subf %16, %15 : vector<128x128xf32>
    %c0_6 = arith.constant 0 : index
    %c0_7 = arith.constant 0 : index
    %18 = vector.load %arg12[%c0_6, %c0_7] : memref<128x128xbf16, #tpu.memory_space<vmem>>, vector<128x128xbf16>
    %cst_8 = arith.constant dense<0.000000e+00> : vector<128x128xf32>
    %19 = tpu.matmul %8, %18, %cst_8 {dimension_numbers = #tpu.dot_dimension_numbers<[1], [1], [0], [0], [0, 0, 1, 0], [], []>} : vector<128x128xbf16>, vector<128x128xbf16>, vector<128x128xf32> -> vector<128x128xf32>
    %cst_9 = arith.constant 1.000000e+00 : f32
    %20 = vector.broadcast %cst_9 : f32 to vector<128x128xf32>
    %21 = arith.subf %20, %19 : vector<128x128xf32>
    %cst_10 = arith.constant 0.000000e+00 : f32
    %22 = vector.broadcast %cst_10 : f32 to vector<128x128xf32>
    %23 = arith.subf %22, %21 : vector<128x128xf32>
    %24 = math.exp %23 : vector<128x128xf32>
    %cst_11 = arith.constant 1.000000e+00 : f32
    %25 = vector.broadcast %cst_11 : f32 to vector<128x128xf32>
    %26 = arith.subf %25, %24 : vector<128x128xf32>
    %27 = arith.mulf %17, %17 : vector<128x128xf32>
    %c0_12 = arith.constant 0 : index
    %c0_13 = arith.constant 0 : index
    %28 = vector.load %arg6[%c0_12, %c0_13] : memref<1x128xf32, #tpu.memory_space<vmem>>, vector<1x128xf32>
    %29 = vector.broadcast %28 : vector<1x128xf32> to vector<128x128xf32>
    %30 = arith.mulf %27, %29 : vector<128x128xf32>
    %cst_14 = arith.constant dense<0.000000e+00> : vector<128xf32>
    %31 = vector.multi_reduction <add>, %30, %cst_14 [1] : vector<128x128xf32> to vector<128xf32>
    %32 = vector.shape_cast %31 : vector<128xf32> to vector<128x1xf32>
    %33 = arith.truncf %17 : vector<128x128xf32> to vector<128x128xbf16>
    %c0_15 = arith.constant 0 : index
    %c0_16 = arith.constant 0 : index
    %34 = vector.load %arg13[%c0_15, %c0_16] : memref<128x128xbf16, #tpu.memory_space<vmem>>, vector<128x128xbf16>
    %cst_17 = arith.constant dense<0.000000e+00> : vector<128x128xf32>
    %35 = tpu.matmul %33, %34, %cst_17 {dimension_numbers = #tpu.dot_dimension_numbers<[1], [0], [0], [1], [0, 0, 1, 1], [], []>} : vector<128x128xbf16>, vector<128x128xbf16>, vector<128x128xf32> -> vector<128x128xf32>
    %36 = arith.truncf %35 : vector<128x128xf32> to vector<128x128xbf16>
    %c0_18 = arith.constant 0 : index
    %c0_19 = arith.constant 0 : index
    %37 = vector.load %arg14[%c0_18, %c0_19] : memref<128x128xbf16, #tpu.memory_space<vmem>>, vector<128x128xbf16>
    %cst_20 = arith.constant dense<0.000000e+00> : vector<128x128xf32>
    %38 = tpu.matmul %36, %37, %cst_20 {dimension_numbers = #tpu.dot_dimension_numbers<[1], [1], [0], [0], [0, 0, 1, 0], [], []>} : vector<128x128xbf16>, vector<128x128xbf16>, vector<128x128xf32> -> vector<128x128xf32>
    %c0_21 = arith.constant 0 : index
    %c0_22 = arith.constant 0 : index
    %39 = vector.load %arg7[%c0_21, %c0_22] : memref<1x128xf32, #tpu.memory_space<vmem>>, vector<1x128xf32>
    %40 = vector.broadcast %32 : vector<128x1xf32> to vector<128x128xf32>
    %41 = vector.broadcast %39 : vector<1x128xf32> to vector<128x128xf32>
    %42 = arith.addf %40, %41 : vector<128x128xf32>
    %cst_23 = arith.constant 2.000000e+00 : f32
    %43 = vector.broadcast %cst_23 : f32 to vector<128x128xf32>
    %44 = arith.mulf %43, %38 : vector<128x128xf32>
    %45 = arith.subf %42, %44 : vector<128x128xf32>
    %c0_24 = arith.constant 0 : index
    %c0_25 = arith.constant 0 : index
    %46 = vector.load %arg9[%c0_24, %c0_25] : memref<128x128xf32, #tpu.memory_space<vmem>>, vector<128x128xf32>
    %c0_26 = arith.constant 0 : index
    %c0_27 = arith.constant 0 : index
    %47 = vector.load %arg8[%c0_26, %c0_27] : memref<128x128xf32, #tpu.memory_space<vmem>>, vector<128x128xf32>
    %c0_28 = arith.constant 0 : index
    %c0_29 = arith.constant 0 : index
    %48 = vector.load %arg15[%c0_28, %c0_29] : memref<1x128xf32, #tpu.memory_space<vmem>>, vector<1x128xf32>
    %49 = arith.mulf %45, %46 : vector<128x128xf32>
    %cst_30 = arith.constant dense<0.000000e+00> : vector<128xf32>
    %50 = vector.multi_reduction <add>, %49, %cst_30 [0] : vector<128x128xf32> to vector<128xf32>
    %51 = vector.shape_cast %50 : vector<128xf32> to vector<1x128xf32>
    %52 = arith.addf %48, %51 : vector<1x128xf32>
    %c0_31 = arith.constant 0 : index
    %c0_32 = arith.constant 0 : index
    %53 = vector.load %arg15[%c0_31, %c0_32] : memref<1x128xf32, #tpu.memory_space<vmem>>, vector<1x128xf32>
    tpu.vector_store %arg15[%c0_31, %c0_32], %52 {strides = array<i32>} : memref<1x128xf32, #tpu.memory_space<vmem>>, vector<1x128xf32>,
    %c0_33 = arith.constant 0 : index
    %c0_34 = arith.constant 0 : index
    %54 = vector.load %arg16[%c0_33, %c0_34] : memref<1x128xf32, #tpu.memory_space<vmem>>, vector<1x128xf32>
    %55 = arith.mulf %26, %46 : vector<128x128xf32>
    %cst_35 = arith.constant dense<0.000000e+00> : vector<128xf32>
    %56 = vector.multi_reduction <add>, %55, %cst_35 [0] : vector<128x128xf32> to vector<128xf32>
    %57 = vector.shape_cast %56 : vector<128xf32> to vector<1x128xf32>
    %58 = arith.addf %54, %57 : vector<1x128xf32>
    %c0_36 = arith.constant 0 : index
    %c0_37 = arith.constant 0 : index
    %59 = vector.load %arg16[%c0_36, %c0_37] : memref<1x128xf32, #tpu.memory_space<vmem>>, vector<1x128xf32>
    tpu.vector_store %arg16[%c0_36, %c0_37], %58 {strides = array<i32>} : memref<1x128xf32, #tpu.memory_space<vmem>>, vector<1x128xf32>,
    %c0_38 = arith.constant 0 : index
    %c0_39 = arith.constant 0 : index
    %60 = vector.load %arg17[%c0_38, %c0_39] : memref<1x128xf32, #tpu.memory_space<vmem>>, vector<1x128xf32>
    %61 = arith.subf %17, %47 : vector<128x128xf32>
    %62 = arith.mulf %61, %61 : vector<128x128xf32>
    %cst_40 = arith.constant 0.000000e+00 : f32
    %63 = vector.broadcast %cst_40 : f32 to vector<128x128xf32>
    %64 = arith.subf %63, %47 : vector<128x128xf32>
    %65 = math.exp %64 : vector<128x128xf32>
    %66 = arith.mulf %62, %65 : vector<128x128xf32>
    %cst_41 = arith.constant dense<0.000000e+00> : vector<128xf32>
    %67 = vector.multi_reduction <add>, %66, %cst_41 [0] : vector<128x128xf32> to vector<128xf32>
    %68 = vector.shape_cast %67 : vector<128xf32> to vector<1x128xf32>
    %69 = arith.addf %60, %68 : vector<1x128xf32>
    %c0_42 = arith.constant 0 : index
    %c0_43 = arith.constant 0 : index
    %70 = vector.load %arg17[%c0_42, %c0_43] : memref<1x128xf32, #tpu.memory_space<vmem>>, vector<1x128xf32>
    tpu.vector_store %arg17[%c0_42, %c0_43], %69 {strides = array<i32>} : memref<1x128xf32, #tpu.memory_space<vmem>>, vector<1x128xf32>,
    %c0_i32_44 = arith.constant 0 : i32
    %71 = arith.cmpi eq, %arg1, %c0_i32_44 : i32
    %72 = arith.extui %71 : i1 to i32
    %c0_i32_45 = arith.constant 0 : i32
    %73 = arith.cmpi ne, %72, %c0_i32_45 : i32
    scf.if %73 {
      %74 = tpu.iota {dimensions = array<i32: 2>} : vector<1x8x128xi32>
      %c0_i32_46 = arith.constant 0 : i32
      %75 = vector.broadcast %c0_i32_46 : i32 to vector<1x8x128xi32>
      %76 = arith.cmpi eq, %74, %75 : vector<1x8x128xi32>
      %c0_47 = arith.constant 0 : index
      %c0_48 = arith.constant 0 : index
      %77 = vector.load %arg15[%c0_47, %c0_48] : memref<1x128xf32, #tpu.memory_space<vmem>>, vector<1x128xf32>
      %78 = vector.shape_cast %77 : vector<1x128xf32> to vector<1x1x128xf32>
      %cst_49 = arith.constant dense<0.000000e+00> : vector<1xf32>
      %79 = vector.multi_reduction <add>, %78, %cst_49 [1, 2] : vector<1x1x128xf32> to vector<1xf32>
      %80 = vector.shape_cast %79 : vector<1xf32> to vector<1x1x1xf32>
      %81 = vector.extract %80[0, 0, 0] : f32 from vector<1x1x1xf32>
      %cst_50 = arith.constant 0.000000e+00 : f32
      %82 = vector.broadcast %81 : f32 to vector<1x8x128xf32>
      %83 = vector.broadcast %cst_50 : f32 to vector<1x8x128xf32>
      %84 = arith.select %76, %82, %83 : vector<1x8x128xi1>, vector<1x8x128xf32>
      %c1_i32_51 = arith.constant 1 : i32
      %85 = vector.broadcast %c1_i32_51 : i32 to vector<1x8x128xi32>
      %86 = arith.cmpi eq, %74, %85 : vector<1x8x128xi32>
      %c0_52 = arith.constant 0 : index
      %c0_53 = arith.constant 0 : index
      %87 = vector.load %arg16[%c0_52, %c0_53] : memref<1x128xf32, #tpu.memory_space<vmem>>, vector<1x128xf32>
      %88 = vector.shape_cast %87 : vector<1x128xf32> to vector<1x1x128xf32>
      %cst_54 = arith.constant dense<0.000000e+00> : vector<1xf32>
      %89 = vector.multi_reduction <add>, %88, %cst_54 [1, 2] : vector<1x1x128xf32> to vector<1xf32>
      %90 = vector.shape_cast %89 : vector<1xf32> to vector<1x1x1xf32>
      %91 = vector.extract %90[0, 0, 0] : f32 from vector<1x1x1xf32>
      %cst_55 = arith.constant 0.000000e+00 : f32
      %92 = vector.broadcast %91 : f32 to vector<1x8x128xf32>
      %93 = vector.broadcast %cst_55 : f32 to vector<1x8x128xf32>
      %94 = arith.select %86, %92, %93 : vector<1x8x128xi1>, vector<1x8x128xf32>
      %95 = arith.addf %84, %94 : vector<1x8x128xf32>
      %c2_i32 = arith.constant 2 : i32
      %96 = vector.broadcast %c2_i32 : i32 to vector<1x8x128xi32>
      %97 = arith.cmpi eq, %74, %96 : vector<1x8x128xi32>
      %c0_56 = arith.constant 0 : index
      %c0_57 = arith.constant 0 : index
      %98 = vector.load %arg17[%c0_56, %c0_57] : memref<1x128xf32, #tpu.memory_space<vmem>>, vector<1x128xf32>
      %99 = vector.shape_cast %98 : vector<1x128xf32> to vector<1x1x128xf32>
      %cst_58 = arith.constant dense<0.000000e+00> : vector<1xf32>
      %100 = vector.multi_reduction <add>, %99, %cst_58 [1, 2] : vector<1x1x128xf32> to vector<1xf32>
      %101 = vector.shape_cast %100 : vector<1xf32> to vector<1x1x1xf32>
      %102 = vector.extract %101[0, 0, 0] : f32 from vector<1x1x1xf32>
      %cst_59 = arith.constant 0.000000e+00 : f32
      %103 = vector.broadcast %102 : f32 to vector<1x8x128xf32>
      %104 = vector.broadcast %cst_59 : f32 to vector<1x8x128xf32>
      %105 = arith.select %97, %103, %104 : vector<1x8x128xi1>, vector<1x8x128xf32>
      %106 = arith.addf %95, %105 : vector<1x8x128xf32>
      %c0_60 = arith.constant 0 : index
      %c0_61 = arith.constant 0 : index
      %c0_62 = arith.constant 0 : index
      %107 = vector.load %arg10[%c0_60, %c0_61, %c0_62] : memref<1x8x128xf32, #tpu.memory_space<vmem>>, vector<1x8x128xf32>
      tpu.vector_store %arg10[%c0_60, %c0_61, %c0_62], %106 {strides = array<i32>} : memref<1x8x128xf32, #tpu.memory_space<vmem>>, vector<1x8x128xf32>,
    } else {
    }
    return
  }
  func.func @transform_4(%arg0: i32, %arg1: i32) -> (i32, i32) {
    %c0_i32 = arith.constant 0 : i32
    %c0_i32_0 = arith.constant 0 : i32
    %c0_i32_1 = arith.constant 0 : i32
    return %c0_i32, %c0_i32_0 : i32, i32
  }
  func.func @transform_5(%arg0: i32, %arg1: i32) -> (i32, i32) {
    %c0_i32 = arith.constant 0 : i32
    %c0_i32_0 = arith.constant 0 : i32
    %c0_i32_1 = arith.constant 0 : i32
    return %c0_i32, %c0_i32_0 : i32, i32
  }
  func.func @transform_6(%arg0: i32, %arg1: i32) -> (i32, i32) {
    %c1_i32 = arith.constant 1 : i32
    %0 = arith.muli %arg0, %c1_i32 : i32
    %1 = arith.addi %0, %arg1 : i32
    %c0_i32 = arith.constant 0 : i32
    %c0_i32_0 = arith.constant 0 : i32
    return %1, %c0_i32 : i32, i32
  }
  func.func @transform_7(%arg0: i32, %arg1: i32) -> (i32, i32) {
    %c1_i32 = arith.constant 1 : i32
    %0 = arith.muli %arg0, %c1_i32 : i32
    %1 = arith.addi %0, %arg1 : i32
    %c0_i32 = arith.constant 0 : i32
    %c0_i32_0 = arith.constant 0 : i32
    return %1, %c0_i32 : i32, i32
  }
  func.func @transform_8(%arg0: i32, %arg1: i32) -> (i32, i32, i32) {
    %c0_i32 = arith.constant 0 : i32
    %c0_i32_0 = arith.constant 0 : i32
    %c0_i32_1 = arith.constant 0 : i32
    return %arg0, %c0_i32, %c0_i32_0 : i32, i32, i32
  }
}

</mosaic_0001>

<bundles_post_ra>
// kernel: forward.1
= control target key start
LH: loop header
LB: loop body
LE: loop exit
PB: predicated region body
PF: predicated region fallthrough
CT: control target
= control target key end

     0   :  { %s2336_s0 = inlined_call_operand.vmem [shape: bf16[128,128], index: 0, kind: input, shape index: {}]   ;;  %s2337_s1 = inlined_call_operand.vmem [shape: bf16[128,128], index: 1, kind: input, shape index: {}]   ;;  %s2338_s2 = inlined_call_operand.vmem [shape: bf16[128,128], index: 2, kind: input, shape index: {}]   ;;  %s2339_s3 = inlined_call_operand.vmem [shape: bf16[128,128], index: 3, kind: input, shape index: {}]   ;;  %s2340_s4 = inlined_call_operand.vmem [shape: f32[1,128], index: 4, kind: input, shape index: {}]   ;;  %s2341_s5 = inlined_call_operand.vmem [shape: f32[1,128], index: 5, kind: input, shape index: {}]   ;;  %s2342_s6 = inlined_call_operand.vmem [shape: f32[128,128], index: 6, kind: input, shape index: {}]   ;;  %s2343_s7 = inlined_call_operand.vmem [shape: f32[128,128], index: 7, kind: input, shape index: {}]   ;;  %s2344_s8 = inlined_call_operand.vmem [shape: f32[1,8,128], index: 8, kind: output, shape index: {}]  }
   0x1   :  { %v102_v0 = vld [vmem:[%s2336_s0] sm:$0xff]  ;;  %v1767_v1 = vld [vmem:[%s2336_s0 + $0x8] sm:$0xff]  ;;  %v1772_v2 = vld [vmem:[%s2336_s0 + $0x10] sm:$0xff] }
   0x2   :  { %v1777_v3 = vld [vmem:[%s2336_s0 + $0x18] sm:$0xff]  ;;  %v1782_v4 = vld [vmem:[%s2336_s0 + $0x20] sm:$0xff]  ;;  %v1787_v5 = vld [vmem:[%s2336_s0 + $0x28] sm:$0xff] }
   0x3   :  { %v1792_v6 = vld [vmem:[%s2336_s0 + $0x30] sm:$0xff]  ;;  %v1797_v7 = vld [vmem:[%s2336_s0 + $0x38] sm:$0xff] }
   0x4   :  { %125 = vsyncadd [#allocation9], 1024  ;;  %v159_v8 = vld [vmem:[%s2337_s1] sm:$0xff]  ;;  %v161_v9 = vld [vmem:[%s2337_s1 + $0x8] sm:$0xff] }
   0x5   :  { %v163_v10 = vld [vmem:[%s2337_s1 + $0x10] sm:$0xff]  ;;  %v165_v11 = vld [vmem:[%s2337_s1 + $0x18] sm:$0xff]  ;;  %v167_v12 = vld [vmem:[%s2337_s1 + $0x20] sm:$0xff] }
   0x6   :  { %v169_v13 = vld [vmem:[%s2337_s1 + $0x28] sm:$0xff]  ;;  %v171_v14 = vld [vmem:[%s2337_s1 + $0x30] sm:$0xff]  ;;  %v173_v15 = vld [vmem:[%s2337_s1 + $0x38] sm:$0xff] }
   0x7   :  { %182 = vsyncadd [#allocation9 + $0x1], 1024  ;;  %v1826_v16 = vld [vmem:[%s2338_s2] sm:$0xff]  ;;  %v1831_v17 = vld [vmem:[%s2338_s2 + $0x8] sm:$0xff] }
   0x8   :  { %v1836_v18 = vld [vmem:[%s2338_s2 + $0x10] sm:$0xff]  ;;  %v1841_v19 = vld [vmem:[%s2338_s2 + $0x18] sm:$0xff]  ;;  %v1846_v20 = vld [vmem:[%s2338_s2 + $0x20] sm:$0xff] }
   0x9   :  { %v1851_v21 = vld [vmem:[%s2338_s2 + $0x28] sm:$0xff]  ;;  %v1856_v22 = vld [vmem:[%s2338_s2 + $0x30] sm:$0xff]  ;;  %v1861_v23 = vld [vmem:[%s2338_s2 + $0x38] sm:$0xff] }
   0xa   :  { %239 = vsyncadd [#allocation9 + $0x2], 1024  ;;  %v273_v24 = vld [vmem:[%s2339_s3] sm:$0xff]  ;;  %v1869_v25 = vld [vmem:[%s2339_s3 + $0x8] sm:$0xff] }
   0xb   :  { %v1874_v26 = vld [vmem:[%s2339_s3 + $0x10] sm:$0xff]  ;;  %v1879_v27 = vld [vmem:[%s2339_s3 + $0x18] sm:$0xff]  ;;  %v1884_v28 = vld [vmem:[%s2339_s3 + $0x20] sm:$0xff] }
   0xc   :  { %v1889_v29 = vld [vmem:[%s2339_s3 + $0x28] sm:$0xff]  ;;  %v1894_v30 = vld [vmem:[%s2339_s3 + $0x30] sm:$0xff]  ;;  %v1899_v31 = vld [vmem:[%s2339_s3 + $0x38] sm:$0xff] }
   0xd   :  { %296 = vsyncadd [#allocation9 + $0x3], 1024 }
   0xe   :  { %1707 = dma.done.wait [#allocation9], 1024 }
   0xf   :  { %1708 = vsyncadd [#allocation9], 4294966272 }
  0x10   :  { %1709 = dma.done.wait [#allocation9 + $0x1], 1024 }
  0x11   :  { %1710 = vsyncadd [#allocation9 + $0x1], 4294966272 }
  0x12   :  { %1711 = dma.done.wait [#allocation9 + $0x2], 1024 }
  0x13   :  { %1712 = vsyncadd [#allocation9 + $0x2], 4294966272  ;;  %1476 = vmatprep.subr.bf16.mxu0 %v102_v0  ;;  %1492 = vmatprep.mubr.bf16.mxu0 %v102_v0 }
  0x14   :  { %1713 = dma.done.wait [#allocation9 + $0x3], 1024 }
  0x15   :  { %1714 = vsyncadd [#allocation9 + $0x3], 4294966272  ;;  %1477 = vmatpush3.bf16.xpose.msra.mxu0 %v102_v0  ;;  %1508 = vmatprep.subr.bf16.mxu1 %v159_v8  ;;  %v1715_v32 = vmov 0.0   ;;  %v1962_v33 = vld [vmem:[%s2342_s6 + $0x10] sm:$0xff]  ;;  %v1967_v34 = vld [vmem:[%s2342_s6] sm:$0xff]  ;;  %vm1285_vm0 = vcmask 1040384  }
  0x16   :  { %1478 = vmatprep.subr.bf16.mxu0 %v1767_v1  ;;  %1509 = vmatpush3.bf16.xpose.msra.mxu1 %v159_v8  ;;  %309 = vst [vmem:[#allocation8] sm:$0x1] %v1715_v32  ;;  %307 = vst [vmem:[#allocation6] sm:$0x1] %v1715_v32  ;;  %v1972_v35 = vld [vmem:[%s2342_s6 + $0x18] sm:$0xff]  ;;  %v1977_v36 = vld [vmem:[%s2342_s6 + $0x8] sm:$0xff] }
  0x17   :  { %1510 = vmatprep.subr.bf16.mxu1 %v161_v9  ;;  %1524 = vmatprep.mubr.bf16.mxu1 %v102_v0  ;;  %308 = vst [vmem:[#allocation7] sm:$0x1] %v1715_v32  ;;  %v1193_v37 = vsub.f32 0.0, %v1962_v33  ;;  %v1191_v38 = vsub.f32 0.0, %v1967_v34  ;;  %v1984_v39 = vld [vmem:[%s2342_s6 + $0x30] sm:$0xff]  ;;  %v1194_v40 = vsub.f32 0.0, %v1972_v35 }
  0x18   :  { %v1990_v41 = vld [vmem:[%s2342_s6 + $0x20] sm:$0xff]  ;;  %v1192_v42 = vsub.f32 0.0, %v1977_v36  ;;  %v1996_v43 = vld [vmem:[%s2342_s6 + $0x38] sm:$0xff]  ;;  %v1197_v45 = vsub.f32 0.0, %v1984_v39  ;;  %v2002_v46 = vld [vmem:[%s2342_s6 + $0x28] sm:$0xff] }
  0x19   :  { %v1211_v44 = vmul.f32 1.442695, %v1193_v37  ;;  %v1207_v47 = vmul.f32 1.442695, %v1191_v38  ;;  %v1195_v48 = vsub.f32 0.0, %v1990_v41  ;;  %v1198_v50 = vsub.f32 0.0, %v1996_v43 }
  0x1a   :  { %v1213_v49 = vmul.f32 1.442695, %v1194_v40  ;;  %v1209_v51 = vmul.f32 1.442695, %v1192_v42  ;;  %v1196_v52 = vsub.f32 0.0, %v2002_v46  ;;  %v2010_v56 = vld [vmem:[%s2342_s6 + $0x50] sm:$0xff] }
  0x1b   :  { %1611 = vpow2.f32 %v1211_v44  ;;  %v1219_v53 = vmul.f32 1.442695, %v1197_v45  ;;  %v1215_v55 = vmul.f32 1.442695, %v1195_v48  ;;  %v1221_v59 = vmul.f32 1.442695, %v1198_v50 }
  0x1c   :  { %1613 = vpow2.f32 %v1207_v47  ;;  %v2015_v60 = vld [vmem:[%s2342_s6 + $0x40] sm:$0xff]  ;;  %v1217_v63 = vmul.f32 1.442695, %v1196_v52  ;;  %v2020_v0 = vld [vmem:[%s2342_s6 + $0x58] sm:$0xff] }
  0x1d   :  { %1479 = vmatpush3.bf16.xpose.msra.mxu0 %v1767_v1  ;;  %1615 = vpow2.f32 %v1213_v49  ;;  %v1199_v8 = vsub.f32 0.0, %v2015_v60 }
  0x1e   :  { %1480 = vmatprep.subr.bf16.mxu0 %v1772_v2  ;;  %1511 = vmatpush3.bf16.xpose.msra.mxu1 %v161_v9  ;;  %1617 = vpow2.f32 %v1209_v51 }
  0x1f   :  { %1512 = vmatprep.subr.bf16.mxu1 %v163_v10  ;;  %1619 = vpow2.f32 %v1219_v53  ;;  %v2054_v53 = vld [vmem:[%s2342_s6 + $0x70] sm:$0xff] }
  0x20   :  { %1621 = vpow2.f32 %v1215_v55 }
  0x21   :  { %1623 = vpow2.f32 %v1221_v59 }
  0x22   :  { %1625 = vpow2.f32 %v1217_v63 }
  0x25   :  { %1481 = vmatpush3.bf16.xpose.msra.mxu0 %v1772_v2 }
  0x26   :  { %1482 = vmatprep.subr.bf16.mxu0 %v1777_v3  ;;  %1513 = vmatpush3.bf16.xpose.msra.mxu1 %v163_v10 }
  0x27   :  { %1514 = vmatprep.subr.bf16.mxu1 %v165_v11 }
  0x2d   :  { %1483 = vmatpush3.bf16.xpose.msra.mxu0 %v1777_v3 }
  0x2e   :  { %1484 = vmatprep.subr.bf16.mxu0 %v1782_v4  ;;  %1515 = vmatpush3.bf16.xpose.msra.mxu1 %v165_v11  ;;  %v1202_v11 = vsub.f32 0.0, %v2020_v0 }
  0x2f   :  { %1516 = vmatprep.subr.bf16.mxu1 %v167_v12 }
  0x35   :  { %1485 = vmatpush3.bf16.xpose.msra.mxu0 %v1782_v4 }
  0x36   :  { %1486 = vmatprep.subr.bf16.mxu0 %v1787_v5  ;;  %1517 = vmatpush3.bf16.xpose.msra.mxu1 %v167_v12 }
  0x37   :  { %1518 = vmatprep.subr.bf16.mxu1 %v169_v13 }
  0x3d   :  { %1487 = vmatpush3.bf16.xpose.msra.mxu0 %v1787_v5 }
  0x3e   :  { %1488 = vmatprep.subr.bf16.mxu0 %v1792_v6  ;;  %1519 = vmatpush3.bf16.xpose.msra.mxu1 %v169_v13 }
  0x3f   :  { %1520 = vmatprep.subr.bf16.mxu1 %v171_v14 }
  0x45   :  { %1489 = vmatpush3.bf16.xpose.msra.mxu0 %v1792_v6 }
  0x46   :  { %1490 = vmatprep.subr.bf16.mxu0 %v1797_v7  ;;  %1521 = vmatpush3.bf16.xpose.msra.mxu1 %v171_v14 }
  0x47   :  { %1522 = vmatprep.subr.bf16.mxu1 %v173_v15 }
  0x4d   :  { %1491 = vmatpush3.bf16.xpose.msra.mxu0 %v1797_v7 }
  0x4e   :  { %1540 = vmatprep.subr.bf16.mxu0 %v1826_v16  ;;  %1523 = vmatpush3.bf16.xpose.msra.mxu1 %v173_v15 }
  0x4f   :  { %1572 = vmatprep.subr.bf16.mxu1 %v273_v24 }
  0x54   :  { %1493 = vmatmul.mubr.bf16.vlgmr.msra.gmra.mrb[0].mxu0 %v1767_v1 }
  0x55   :  { %1496 = vmatprep.mubr.bf16.mxu0 %v1772_v2  ;;  %1541 = vmatpush3.bf16.msra.mxu0 %v1826_v16 }
  0x56   :  { %1542 = vmatprep.subr.bf16.mxu0 %v1831_v17  ;;  %1525 = vmatmul.mubr.bf16.vlgmr.msra.gmra.mrb[0].mxu1 %v1767_v1 }
  0x57   :  { %1528 = vmatprep.mubr.bf16.mxu1 %v1772_v2  ;;  %1573 = vmatpush3.bf16.xpose.msra.mxu1 %v273_v24  ;;  %v1229_v24 = vmul.f32 1.442695, %v1202_v11 }
  0x58   :  { %1574 = vmatprep.subr.bf16.mxu1 %v1869_v25 }
  0x59   :  { %1543 = vmatpush3.bf16.msra.mxu0 %v1831_v17 }
  0x5a   :  { %1544 = vmatprep.subr.bf16.mxu0 %v1836_v18 }
  0x5c   :  { %1497 = vmatmul.mubr.bf16.gmra.mrb[4].mxu0 %v1777_v3 }
  0x5d   :  { %1500 = vmatprep.mubr.bf16.mxu0 %v1782_v4  ;;  %1545 = vmatpush3.bf16.msra.mxu0 %v1836_v18 }
  0x5e   :  { %1546 = vmatprep.subr.bf16.mxu0 %v1841_v19  ;;  %1529 = vmatmul.mubr.bf16.gmra.mrb[4].mxu1 %v1777_v3 }
  0x5f   :  { %1532 = vmatprep.mubr.bf16.mxu1 %v1782_v4  ;;  %1575 = vmatpush3.bf16.xpose.msra.mxu1 %v1869_v25  ;;  %v1201_v4 = vsub.f32 0.0, %v2010_v56 }
  0x60   :  { %1576 = vmatprep.subr.bf16.mxu1 %v1874_v26 }
  0x61   :  { %1547 = vmatpush3.bf16.msra.mxu0 %v1841_v19  ;;  %v1227_v16 = vmul.f32 1.442695, %v1201_v4  ;;  %v1223_v19 = vmul.f32 1.442695, %v1199_v8  ;;  %v1205_v4 = vsub.f32 0.0, %v2054_v53 }
  0x62   :  { %1548 = vmatprep.subr.bf16.mxu0 %v1846_v20 }
  0x64   :  { %1501 = vmatmul.mubr.bf16.gmra.mrb[8].mxu0 %v1787_v5 }
  0x65   :  { %1504 = vmatprep.mubr.bf16.mxu0 %v1792_v6  ;;  %1549 = vmatpush3.bf16.msra.mxu0 %v1846_v20  ;;  %v2034_v20 = vld [vmem:[%s2342_s6 + $0x60] sm:$0xff] }
  0x66   :  { %1550 = vmatprep.subr.bf16.mxu0 %v1851_v21  ;;  %1533 = vmatmul.mubr.bf16.gmra.mrb[8].mxu1 %v1787_v5  ;;  %v2026_v5 = vld [vmem:[%s2342_s6 + $0x48] sm:$0xff]  ;;  %v1203_v37 = vsub.f32 0.0, %v2034_v20 }
  0x67   :  { %1536 = vmatprep.mubr.bf16.mxu1 %v1792_v6  ;;  %1577 = vmatpush3.bf16.xpose.msra.mxu1 %v1874_v26  ;;  %v1200_v14 = vsub.f32 0.0, %v2026_v5 }
  0x68   :  { %1578 = vmatprep.subr.bf16.mxu1 %v1879_v27 }
  0x69   :  { %1551 = vmatpush3.bf16.msra.mxu0 %v1851_v21  ;;  %v2036_v21 = vpop.eup %1611 }
  0x6a   :  { %1552 = vmatprep.subr.bf16.mxu0 %v1856_v22  ;;  %v2038_v25 = vpop.eup %1613 }
  0x6c   :  { %1505 = vmatmul.mubr.bf16.gmra.mrb[12].mxu0 %v1797_v7 }
  0x6d   :  { %1553 = vmatpush3.bf16.msra.mxu0 %v1856_v22 }
  0x6e   :  { %1554 = vmatprep.subr.bf16.mxu0 %v1861_v23  ;;  %1537 = vmatmul.mubr.bf16.gmra.mrb[12].mxu1 %v1797_v7 }
  0x6f   :  { %1579 = vmatpush3.bf16.xpose.msra.mxu1 %v1879_v27 }
  0x70   :  { %1580 = vmatprep.subr.bf16.mxu1 %v1884_v28 }
  0x71   :  { %1555 = vmatpush3.bf16.msra.mxu0 %v1861_v23 }
  0x77   :  { %1581 = vmatpush3.bf16.xpose.msra.mxu1 %v1884_v28  ;;  %v1225_v28 = vmul.f32 1.442695, %v1200_v14 }
  0x78   :  { %1582 = vmatprep.subr.bf16.mxu1 %v1889_v29 }
  0x7f   :  { %1583 = vmatpush3.bf16.xpose.msra.mxu1 %v1889_v29  ;;  %v2040_v29 = vpop.eup %1615 }
  0x80   :  { %1584 = vmatprep.subr.bf16.mxu1 %v1894_v30  ;;  %v2043_v38 = vpop.eup %1617 }
  0x81   :  { %v2045_v44 = vpop.eup %1619 }
  0x82   :  { %v2047_v48 = vpop.eup %1621 }
  0x83   :  { %v2049_v51 = vpop.eup %1623 }
  0x84   :  { %v2056_v55 = vpop.eup %1625 }
  0x87   :  { %1585 = vmatpush3.bf16.xpose.msra.mxu1 %v1894_v30 }
  0x88   :  { %1586 = vmatprep.subr.bf16.mxu1 %v1899_v31 }
  0x8f   :  { %1587 = vmatpush3.bf16.xpose.msra.mxu1 %v1899_v31 }
 0x127   :  { %v1494_v54 = vpop.f32.mrb[0].mxu0 }
 0x128   :  { %v431_v57 = vsub.f32 1.0, %v1494_v54  ;;  %v366_v58 = vpop.f32.mrb[1].mxu0  ;;  %v1231_v54 = vmul.f32 1.442695, %v1203_v37 }
 0x129   :  { %v429_v61 = vsub.f32 1.0, %v366_v58  ;;  %v1495_v62 = vpop.f32.mrb[2].mxu0 }
 0x12a   :  { %v447_v1 = vmul.f32 -5.0, %v431_v57  ;;  %v432_v2 = vsub.f32 1.0, %v1495_v62  ;;  %v369_v3 = vpop.f32.mrb[3].mxu0 }
 0x12b   :  { %v445_v6 = vmul.f32 -5.0, %v429_v61  ;;  %v430_v7 = vsub.f32 1.0, %v369_v3 }
 0x12c   :  { %v465_v9 = vmul.f32 1.442695, %v447_v1  ;;  %v448_v10 = vmul.f32 -5.0, %v432_v2 }
 0x12d   :  { %v461_v12 = vmul.f32 1.442695, %v445_v6  ;;  %v446_v13 = vmul.f32 -5.0, %v430_v7 }
 0x12e   :  { %1627 = vpow2.f32 %v465_v9  ;;  %v467_v15 = vmul.f32 1.442695, %v448_v10 }
 0x12f   :  { %1629 = vpow2.f32 %v461_v12  ;;  %v463_v17 = vmul.f32 1.442695, %v446_v13  ;;  %v1498_v18 = vpop.f32.mrb[4].mxu0 }
 0x130   :  { %1631 = vpow2.f32 %v467_v15  ;;  %v435_v22 = vsub.f32 1.0, %v1498_v18  ;;  %v382_v23 = vpop.f32.mrb[5].mxu0 }
 0x131   :  { %1633 = vpow2.f32 %v463_v17  ;;  %v433_v26 = vsub.f32 1.0, %v382_v23  ;;  %v1499_v27 = vpop.f32.mrb[6].mxu0 }
 0x132   :  { %v451_v30 = vmul.f32 -5.0, %v435_v22  ;;  %v436_v31 = vsub.f32 1.0, %v1499_v27  ;;  %v385_v32 = vpop.f32.mrb[7].mxu0  ;;  %1635 = vpow2.f32 %v1227_v16 }
 0x133   :  { %v449_v40 = vmul.f32 -5.0, %v433_v26  ;;  %v434_v42 = vsub.f32 1.0, %v385_v32  ;;  %1637 = vpow2.f32 %v1223_v19 }
 0x134   :  { %v473_v45 = vmul.f32 1.442695, %v451_v30  ;;  %v452_v47 = vmul.f32 -5.0, %v436_v31  ;;  %1639 = vpow2.f32 %v1229_v24 }
 0x135   :  { %v469_v49 = vmul.f32 1.442695, %v449_v40  ;;  %v450_v50 = vmul.f32 -5.0, %v434_v42  ;;  %1641 = vpow2.f32 %v1225_v28 }
 0x136   :  { %1643 = vpow2.f32 %v473_v45  ;;  %v475_v52 = vmul.f32 1.442695, %v452_v47  ;;  %v2085_v45 = vmul.f32 1.442695, %v1205_v4 }
 0x137   :  { %1645 = vpow2.f32 %v469_v49  ;;  %v471_v57 = vmul.f32 1.442695, %v450_v50  ;;  %v1502_v58 = vpop.f32.mrb[8].mxu0 }
 0x138   :  { %v1628_v59 = vpop.eup %1627  ;;  %1647 = vpow2.f32 %v475_v52  ;;  %v439_v61 = vsub.f32 1.0, %v1502_v58  ;;  %v398_v62 = vpop.f32.mrb[9].mxu0 }
 0x139   :  { %v1630_v63 = vpop.eup %1629  ;;  %v2058_v1 = vsub.f32 1.0, %v1628_v59  ;;  %1649 = vpow2.f32 %v471_v57  ;;  %v437_v2 = vsub.f32 1.0, %v398_v62  ;;  %v1503_v3 = vpop.f32.mrb[10].mxu0 }
 0x13a   :  { %v1632_v6 = vpop.eup %1631  ;;  %v2061_v7 = vsub.f32 1.0, %v1630_v63  ;;  %v455_v8 = vmul.f32 -5.0, %v439_v61  ;;  %v440_v9 = vsub.f32 1.0, %v1503_v3  ;;  %v401_v10 = vpop.f32.mrb[11].mxu0  ;;  %1651 = vpow2.f32 %v1231_v54 }
 0x13b   :  { %v1634_v11 = vpop.eup %1633  ;;  %v2063_v12 = vsub.f32 1.0, %v1632_v6  ;;  %v1161_v13 = vsub.f32 %v2058_v1, %v1962_v33  ;;  %v453_v14 = vmul.f32 -5.0, %v437_v2  ;;  %v438_v15 = vsub.f32 1.0, %v401_v10 }
 0x13c   :  { %v2067_v16 = vpop.eup %1635  ;;  %v1159_v17 = vsub.f32 %v2061_v7, %v1967_v34  ;;  %v2071_v18 = vsub.f32 1.0, %v1634_v11  ;;  %v481_v19 = vmul.f32 1.442695, %v455_v8  ;;  %v456_v22 = vmul.f32 -5.0, %v440_v9  ;;  %v2104_v8 = vld [vmem:[%s2342_s6 + $0x68] sm:$0xff] }
 0x13d   :  { %v2073_v23 = vpop.eup %1637  ;;  %v766_v24 = vpack.c.bf16 %v2063_v12, %v2058_v1  ;;  %v1162_v26 = vsub.f32 %v2063_v12, %v1972_v35  ;;  %v1177_v33 = vmul.f32 %v1161_v13, %v1161_v13  ;;  %v477_v27 = vmul.f32 1.442695, %v453_v14 }
 0x13e   :  { %v2079_v28 = vpop.eup %1639  ;;  %v1175_v30 = vmul.f32 %v1159_v17, %v1159_v17  ;;  %v1160_v34 = vsub.f32 %v2071_v18, %v1977_v36  ;;  %1653 = vpow2.f32 %v481_v19  ;;  %v483_v31 = vmul.f32 1.442695, %v456_v22  ;;  %v2091_v36 = vld [vmem:[%s2340_s4] ss:$0 sm:$0xff] }
 0x13f   :  { %v2083_v32 = vpop.eup %1641  ;;  %v1178_v37 = vmul.f32 %v1162_v26, %v1162_v26  ;;  %1655 = vpow2.f32 %v477_v27  ;;  %v454_v40 = vmul.f32 -5.0, %v438_v15  ;;  %v1506_v42 = vpop.f32.mrb[12].mxu0  ;;  %v1241_v49 = vmul.f32 %v2036_v21, %v1177_v33 }
 0x140   :  { %v1644_v47 = vpop.eup %1643  ;;  %v1176_v35 = vmul.f32 %v1160_v34, %v1160_v34  ;;  %1657 = vpow2.f32 %v483_v31  ;;  %v443_v50 = vsub.f32 1.0, %v1506_v42  ;;  %v414_v52 = vpop.f32.mrb[13].mxu0  ;;  %v1239_v57 = vmul.f32 %v2038_v25, %v1175_v30 }
 0x141   :  { %v1646_v54 = vpop.eup %1645  ;;  %v2094_v58 = vsub.f32 1.0, %v1644_v47  ;;  %v479_v59 = vmul.f32 1.442695, %v454_v40  ;;  %v696_v61 = vmul.f32 %v2058_v1, %v2058_v1  ;;  %v1507_v62 = vpop.f32.mrb[14].mxu0  ;;  %v441_v4 = vsub.f32 1.0, %v414_v52 }
 0x142   :  { %v1648_v63 = vpop.eup %1647  ;;  %v1240_v21 = vmul.f32 %v2043_v38, %v1176_v35  ;;  %v2099_v2 = vsub.f32 1.0, %v1646_v54  ;;  %v459_v3 = vmul.f32 -5.0, %v443_v50  ;;  %v417_v6 = vpop.f32.mrb[15].mxu0  ;;  %v1204_v26 = vsub.f32 0.0, %v2104_v8 }
 0x143   :  { %v1650_v25 = vpop.eup %1649  ;;  %v1165_v9 = vsub.f32 %v2094_v58, %v1984_v39  ;;  %v2108_v10 = vsub.f32 1.0, %v1648_v63  ;;  %1659 = vpow2.f32 %v479_v59  ;;  %v719_v11 = vmul.f32 %v2091_v36, %v696_v61 }
 0x144   :  { %v2111_v38 = vpop.eup %1651  ;;  %v1255_v13 = vadd.f32 %v1240_v21, %v1239_v57  ;;  %v1163_v14 = vsub.f32 %v2099_v2, %v1990_v41  ;;  %v2115_v15 = vsub.f32 1.0, %v1650_v25  ;;  %v489_v17 = vmul.f32 1.442695, %v459_v3  ;;  %v2144_v3 = vld [vmem:[%s2342_s6 + $0x78] sm:$0xff] }
 0x145   :  { %v1166_v19 = vsub.f32 %v2108_v10, %v1996_v43  ;;  %737 = vadd.xlane.f32.xlu1 %v719_v11  ;;  %v457_v22 = vmul.f32 -5.0, %v441_v4  ;;  %v765_v39 = vpack.c.bf16 %v2071_v18, %v2061_v7  ;;  %v1242_v33 = vmul.f32 %v2040_v29, %v1178_v37 }
 0x146   :  { %v1256_v27 = vadd.f32 %v1255_v13, %v1241_v49  ;;  %v1179_v30 = vmul.f32 %v1163_v14, %v1163_v14  ;;  %v1164_v41 = vsub.f32 %v2115_v15, %v2002_v46  ;;  %v1181_v34 = vmul.f32 %v1165_v9, %v1165_v9 }
 0x147   :  { %1661 = vpow2.f32 %v489_v17  ;;  %v485_v31 = vmul.f32 1.442695, %v457_v22  ;;  %1556 = vmatprep.mubr.bf16.mxu0 %v765_v39  ;;  %v694_v43 = vmul.f32 %v2061_v7, %v2061_v7  ;;  %v444_v50 = vsub.f32 1.0, %v1507_v62 }
 0x148   :  { %v1654_v40 = vpop.eup %1653  ;;  %v1243_v42 = vmul.f32 %v2047_v48, %v1179_v30  ;;  %v1257_v47 = vadd.f32 %v1256_v27, %v1242_v33  ;;  %v1180_v35 = vmul.f32 %v1164_v41, %v1164_v41  ;;  %1557 = vmatmul.mubr.bf16.vlgmr.msra.gmra.mrb[16].mxu0 %v766_v24  ;;  %v1182_v37 = vmul.f32 %v1166_v19, %v1166_v19 }
 0x149   :  { %v1656_v29 = vpop.eup %1655  ;;  %v2131_v46 = vsub.f32 1.0, %v1654_v40  ;;  %1663 = vpow2.f32 %v485_v31  ;;  %v717_v49 = vmul.f32 %v2091_v36, %v694_v43  ;;  %v460_v48 = vmul.f32 -5.0, %v444_v50 }
 0x14a   :  { %v1658_v52 = vpop.eup %1657  ;;  %v1258_v54 = vadd.f32 %v1257_v47, %v1243_v42  ;;  %v1244_v7 = vmul.f32 %v2056_v55, %v1180_v35  ;;  %v501_v57 = vsub.f32 1.0, %v1656_v29  ;;  %v1245_v59 = vmul.f32 %v2045_v44, %v1181_v34 }
 0x14b   :  { %v2136_v61 = vsub.f32 1.0, %v1658_v52  ;;  %733 = vadd.xlane.f32.xlu0 %v717_v49  ;;  %v442_v1 = vsub.f32 1.0, %v417_v6  ;;  %v697_v24 = vmul.f32 %v2063_v12, %v2063_v12  ;;  %v491_v21 = vmul.f32 1.442695, %v460_v48 }
 0x14c   :  { %v1259_v62 = vadd.f32 %v1258_v54, %v1244_v7  ;;  %v1167_v63 = vsub.f32 %v501_v57, %v2015_v60  ;;  %v695_v55 = vmul.f32 %v2071_v18, %v2071_v18  ;;  %v1246_v4 = vmul.f32 %v2049_v51, %v1182_v37 }
 0x14d   :  { %v1660_v44 = vpop.eup %1659  ;;  %v1169_v6 = vsub.f32 %v2131_v46, %v2010_v56  ;;  %v458_v25 = vmul.f32 -5.0, %v442_v1  ;;  %v720_v12 = vmul.f32 %v2091_v36, %v697_v24  ;;  %1665 = vpow2.f32 %v491_v21 }
 0x14e   :  { %v1260_v9 = vadd.f32 %v1259_v62, %v1245_v59  ;;  %v1183_v60 = vmul.f32 %v1167_v63, %v1167_v63  ;;  %v502_v11 = vsub.f32 1.0, %v1660_v44  ;;  %v1170_v13 = vsub.f32 %v2136_v61, %v2020_v0 }
 0x14f   :  { %v1206_v14 = vsub.f32 0.0, %v2144_v3  ;;  %v487_v17 = vmul.f32 1.442695, %v458_v25  ;;  %739 = vadd.xlane.f32.xlu1 %v720_v12  ;;  %v718_v18 = vmul.f32 %v2091_v36, %v695_v55  ;;  %v767_v22 = vpack.c.bf16 %v2115_v15, %v2099_v2 }
 0x150   :  { %v1247_v51 = vmul.f32 %v2073_v23, %v1183_v60  ;;  %v1261_v19 = vadd.f32 %v1260_v9, %v1246_v4  ;;  %v1168_v56 = vsub.f32 %v502_v11, %v2026_v5  ;;  %v1185_v33 = vmul.f32 %v1169_v6, %v1169_v6 }
 0x151   :  { %v1662_v39 = vpop.eup %1661  ;;  %1667 = vpow2.f32 %v487_v17  ;;  %v1233_v27 = vmul.f32 1.442695, %v1204_v26  ;;  %735 = vadd.xlane.f32.xlu0 %v718_v18  ;;  %v698_v0 = vmul.f32 %v2099_v2, %v2099_v2  ;;  %1560 = vmatprep.mubr.bf16.mxu0 %v767_v22  ;;  %v768_v23 = vpack.c.bf16 %v2108_v10, %v2094_v58 }
 0x152   :  { %v1262_v30 = vadd.f32 %v1261_v19, %v1247_v51  ;;  %v1184_v41 = vmul.f32 %v1168_v56, %v1168_v56  ;;  %v699_v5 = vmul.f32 %v2115_v15, %v2115_v15  ;;  %v1186_v31 = vmul.f32 %v1170_v13, %v1170_v13 }
 0x153   :  { %v1664_v34 = vpop.eup %1663  ;;  %v721_v43 = vmul.f32 %v2091_v36, %v698_v0  ;;  %v700_v26 = vmul.f32 %v2094_v58, %v2094_v58  ;;  %v701_v40 = vmul.f32 %v2108_v10, %v2108_v10  ;;  %1561 = vmatmul.mubr.bf16.gmra.mrb[20].mxu0 %v768_v23  ;;  %v769_v35 = vpack.c.bf16 %v502_v11, %v501_v57 }
 0x154   :  { %v1248_v2 = vmul.f32 %v2083_v32, %v1184_v41  ;;  %v505_v42 = vsub.f32 1.0, %v1664_v34  ;;  %v722_v47 = vmul.f32 %v2091_v36, %v699_v5  ;;  %v1249_v50 = vmul.f32 %v2067_v16, %v1185_v33 }
 0x155   :  { %v1237_v15 = vmul.f32 1.442695, %v1206_v14  ;;  %1669 = vpow2.f32 %v1233_v27  ;;  %741 = vadd.xlane.f32.xlu0 %v721_v43  ;;  %v702_v29 = vmul.f32 %v501_v57, %v501_v57  ;;  %1564 = vmatprep.mubr.bf16.mxu0 %v769_v35  ;;  %v770_v58 = vpack.c.bf16 %v2136_v61, %v2131_v46  ;;  %v1158_v43 = vld [vmem:[#allocation8] sm:$0x1] }
 0x156   :  { %v1263_v37 = vadd.f32 %v1262_v30, %v1248_v2  ;;  %v1171_v49 = vsub.f32 %v505_v42, %v2034_v20  ;;  %743 = vadd.xlane.f32.xlu1 %v722_v47  ;;  %v1250_v32 = vmul.f32 %v2079_v28, %v1186_v31  ;;  %1671 = vpow2.f32 %v2085_v45  ;;  %v1526_v2 = vpop.f32.mrb[0].mxu1 }
 0x157   :  { %v723_v10 = vmul.f32 %v2091_v36, %v700_v26  ;;  %v703_v52 = vmul.f32 %v502_v11, %v502_v11  ;;  %v1666_v16 = vpop.eup %1665  ;;  %v507_v7 = vsub.f32 1.0, %v1662_v39  ;;  %v724_v57 = vmul.f32 %v2091_v36, %v701_v40  ;;  %v551_v47 = vpop.f32.mrb[1].mxu1 }
 0x158   :  { %v1264_v54 = vadd.f32 %v1263_v37, %v1249_v50  ;;  %v1187_v48 = vmul.f32 %v1171_v49, %v1171_v49  ;;  %v508_v59 = vsub.f32 1.0, %v1666_v16  ;;  %1673 = vpow2.f32 %v1237_v15  ;;  %v1527_v50 = vpop.f32.mrb[2].mxu1 }
 0x159   :  { %745 = vadd.xlane.f32.xlu0 %v723_v10  ;;  %v725_v20 = vmul.f32 %v2091_v36, %v702_v29  ;;  %v726_v28 = vmul.f32 %v2091_v36, %v703_v52  ;;  %v704_v62 = vmul.f32 %v2131_v46, %v2131_v46  ;;  %v1173_v21 = vsub.f32 %v507_v7, %v2054_v53  ;;  %v554_v37 = vpop.f32.mrb[3].mxu1 }
 0x15a   :  { %v1251_v1 = vmul.f32 %v2111_v38, %v1187_v48  ;;  %v1265_v24 = vadd.f32 %v1264_v54, %v1250_v32  ;;  %747 = vadd.xlane.f32.xlu1 %v724_v57  ;;  %v772_v63 = vpack.c.bf16 %v508_v59, %v507_v7  ;;  %v705_v4 = vmul.f32 %v2136_v61, %v2136_v61 }
 0x15b   :  { %v1668_v45 = vpop.eup %1667  ;;  %1565 = vmatmul.mubr.bf16.gmra.mrb[24].mxu0 %v770_v58  ;;  %v706_v6 = vmul.f32 %v505_v42, %v505_v42  ;;  %v1174_v38 = vsub.f32 %v508_v59, %v2144_v3  ;;  %v727_v46 = vmul.f32 %v2091_v36, %v704_v62  ;;  %v1189_v11 = vmul.f32 %v1173_v21, %v1173_v21  ;;  %v1530_v58 = vpop.f32.mrb[4].mxu1 }
 0x15c   :  { %v1266_v55 = vadd.f32 %v1265_v24, %v1251_v1  ;;  %v506_v44 = vsub.f32 1.0, %v1668_v45  ;;  %v728_v13 = vmul.f32 %v2091_v36, %v705_v4  ;;  %v708_v51 = vmul.f32 %v507_v7, %v507_v7  ;;  %v567_v16 = vpop.f32.mrb[5].mxu1 }
 0x15d   :  { %749 = vadd.xlane.f32.xlu0 %v725_v20  ;;  %v729_v61 = vmul.f32 %v2091_v36, %v706_v6  ;;  %v1190_v17 = vmul.f32 %v1174_v38, %v1174_v38  ;;  %v709_v22 = vmul.f32 %v508_v59, %v508_v59  ;;  %v614_v35 = vsub.f32 1.0, %v551_v47  ;;  %v1531_v57 = vpop.f32.mrb[6].mxu1 }
 0x15e   :  { %v1172_v25 = vsub.f32 %v506_v44, %v2104_v8  ;;  %751 = vadd.xlane.f32.xlu1 %v726_v28  ;;  %v771_v12 = vpack.c.bf16 %v506_v44, %v505_v42  ;;  %v707_v9 = vmul.f32 %v506_v44, %v506_v44  ;;  %v731_v27 = vmul.f32 %v2091_v36, %v708_v51  ;;  %v570_v24 = vpop.f32.mrb[7].mxu1 }
 0x15f   :  { %v1670_v60 = vpop.eup %1669  ;;  %v732_v30 = vmul.f32 %v2091_v36, %v709_v22  ;;  %v616_v42 = vsub.f32 1.0, %v1526_v2  ;;  %v617_v29 = vsub.f32 1.0, %v1527_v50  ;;  %v615_v49 = vsub.f32 1.0, %v554_v37  ;;  %v2216_v37 = vld [vmem:[%s2343_s7 + $0x18] sm:$0xff] }
 0x160   :  { %v1188_v53 = vmul.f32 %v1172_v25, %v1172_v25  ;;  %1568 = vmatprep.mubr.bf16.mxu0 %v771_v12  ;;  %v1672_v14 = vpop.eup %1671  ;;  %v730_v8 = vmul.f32 %v2091_v36, %v707_v9  ;;  %v630_v36 = vsub.f32 0.0, %v614_v35  ;;  %v620_v52 = vsub.f32 1.0, %v1530_v58 }
 0x161   :  { %753 = vadd.xlane.f32.xlu0 %v727_v46  ;;  %v1253_v19 = vmul.f32 %v1672_v14, %v1189_v11  ;;  %v632_v15 = vsub.f32 0.0, %v616_v42  ;;  %v633_v10 = vsub.f32 0.0, %v617_v29  ;;  %v631_v7 = vsub.f32 0.0, %v615_v49 }
 0x162   :  { %v1252_v18 = vmul.f32 %v1670_v60, %v1188_v53  ;;  %755 = vadd.xlane.f32.xlu1 %v728_v13  ;;  %v1674_v3 = vpop.eup %1673  ;;  %v646_v54 = vmul.f32 1.442695, %v630_v36  ;;  %v618_v48 = vsub.f32 1.0, %v567_v16  ;;  %v636_v20 = vsub.f32 0.0, %v620_v52 }
 0x163   :  { %1569 = vmatmul.mubr.bf16.gmra.mrb[28].mxu0 %v772_v63  ;;  %v1254_v39 = vmul.f32 %v1674_v3, %v1190_v17  ;;  %v650_v32 = vmul.f32 1.442695, %v632_v15  ;;  %v652_v59 = vmul.f32 1.442695, %v633_v10  ;;  %v621_v1 = vsub.f32 1.0, %v1531_v57  ;;  %v1534_v63 = vpop.f32.mrb[8].mxu1 }
 0x164   :  { %v1267_v56 = vadd.f32 %v1266_v55, %v1252_v18  ;;  %v648_v28 = vmul.f32 1.442695, %v631_v7  ;;  %v634_v45 = vsub.f32 0.0, %v618_v48  ;;  %v619_v62 = vsub.f32 1.0, %v570_v24  ;;  %v583_v4 = vpop.f32.mrb[9].mxu1  ;;  %v2229_v24 = vld [vmem:[%s2343_s7 + $0x28] sm:$0xff] }
 0x165   :  { %757 = vadd.xlane.f32.xlu0 %v729_v61  ;;  %1675 = vpow2.f32 %v650_v32  ;;  %v658_v21 = vmul.f32 1.442695, %v636_v20  ;;  %v637_v55 = vsub.f32 0.0, %v621_v1  ;;  %v624_v44 = vsub.f32 1.0, %v1534_v63  ;;  %v1535_v12 = vpop.f32.mrb[10].mxu1 }
 0x166   :  { %v1268_v33 = vadd.f32 %v1267_v56, %v1253_v19  ;;  %759 = vadd.xlane.f32.xlu1 %v730_v8  ;;  %1677 = vpow2.f32 %v646_v54  ;;  %v654_v6 = vmul.f32 1.442695, %v634_v45  ;;  %v635_v38 = vsub.f32 0.0, %v619_v62  ;;  %v586_v46 = vpop.f32.mrb[11].mxu1  ;;  %v2223_v54 = vld [vmem:[%s2343_s7 + $0x20] sm:$0xff] }
 0x167   :  { %1679 = vpow2.f32 %v652_v59  ;;  %v622_v25 = vsub.f32 1.0, %v583_v4  ;;  %v660_v9 = vmul.f32 1.442695, %v637_v55  ;;  %v625_v60 = vsub.f32 1.0, %v1535_v12  ;;  %v1538_v14 = vpop.f32.mrb[12].mxu1  ;;  %v2235_v55 = vld [vmem:[%s2343_s7 + $0x30] sm:$0xff] }
 0x168   :  { %v1269_v0 = vadd.f32 %v1268_v33, %v1254_v39  ;;  %1681 = vpow2.f32 %v648_v28  ;;  %v656_v11 = vmul.f32 1.442695, %v635_v38  ;;  %v623_v13 = vsub.f32 1.0, %v586_v46  ;;  %v599_v17 = vpop.f32.mrb[13].mxu1  ;;  %v2241_v12 = vld [vmem:[%s2343_s7 + $0x38] sm:$0xff] }
 0x169   :  { %761 = vadd.xlane.f32.xlu0 %v731_v27  ;;  %1683 = vpow2.f32 %v654_v6  ;;  %v638_v53 = vsub.f32 0.0, %v622_v25  ;;  %v640_v61 = vsub.f32 0.0, %v624_v44  ;;  %v626_v3 = vsub.f32 1.0, %v599_v17  ;;  %v1539_v51 = vpop.f32.mrb[14].mxu1 }
 0x16a   :  { %v1270_v41 = vrot.slane %v1269_v0, 4  ;;  %763 = vadd.xlane.f32.xlu1 %v732_v30  ;;  %1685 = vpow2.f32 %v658_v21  ;;  %v639_v8 = vsub.f32 0.0, %v623_v13  ;;  %v602_v19 = vpop.f32.mrb[15].mxu1  ;;  %v641_v56 = vsub.f32 0.0, %v625_v60 }
 0x16b   :  { %1687 = vpow2.f32 %v656_v11  ;;  %v662_v18 = vmul.f32 1.442695, %v638_v53  ;;  %v627_v39 = vsub.f32 1.0, %v602_v19  ;;  %v666_v30 = vmul.f32 1.442695, %v640_v61  ;;  %v2247_v53 = vld [vmem:[%s2343_s7 + $0x40] sm:$0xff] }
 0x16c   :  { %v1271_v23 = vadd.f32 %v1270_v41, %v1269_v0  ;;  %1689 = vpow2.f32 %v660_v9  ;;  %v664_v22 = vmul.f32 1.442695, %v639_v8  ;;  %v2200_v0 = vld [vmem:[%s2343_s7] sm:$0xff]  ;;  %v628_v41 = vsub.f32 1.0, %v1538_v14 }
 0x16d   :  { %1691 = vpow2.f32 %v662_v18  ;;  %v668_v2 = vmul.f32 1.442695, %v641_v56  ;;  %v629_v42 = vsub.f32 1.0, %v1539_v51  ;;  %v643_v47 = vsub.f32 0.0, %v627_v39  ;;  %v2253_v18 = vld [vmem:[%s2343_s7 + $0x48] sm:$0xff]  ;;  %v2259_v56 = vld [vmem:[%s2343_s7 + $0x50] sm:$0xff] }
 0x16e   :  { %v1272_v5 = vrot.slane %v1271_v23, 2  ;;  %1693 = vpow2.f32 %v664_v22  ;;  %v644_v36 = vsub.f32 0.0, %v628_v41 }
 0x16f   :  { %v1676_v33 = vpop.eup %1675  ;;  %1695 = vpow2.f32 %v666_v30  ;;  %v645_v7 = vsub.f32 0.0, %v629_v42  ;;  %v672_v48 = vmul.f32 1.442695, %v643_v47  ;;  %v2265_v30 = vld [vmem:[%s2343_s7 + $0x58] sm:$0xff] }
 0x170   :  { %v1273_v34 = vadd.f32 %v1272_v5, %v1271_v23  ;;  %v1678_v27 = vpop.eup %1677  ;;  %v642_v23 = vsub.f32 0.0, %v626_v3  ;;  %1697 = vpow2.f32 %v668_v2  ;;  %v674_v28 = vmul.f32 1.442695, %v644_v36  ;;  %v2283_v36 = vld [vmem:[%s2343_s7 + $0x70] sm:$0xff] }
 0x171   :  { %v1680_v5 = vpop.eup %1679  ;;  %v676_v44 = vmul.f32 1.442695, %v645_v7 }
 0x172   :  { %v1274_v31 = vrot.slane %v1273_v34, 1  ;;  %v681_v50 = vsub.f32 1.0, %v1680_v5  ;;  %v670_v49 = vmul.f32 1.442695, %v642_v23 }
 0x174   :  { %v1275_v26 = vadd.f32 %v1274_v31, %v1273_v34  ;;  %v680_v34 = vsub.f32 1.0, %v1676_v33  ;;  %v678_v31 = vsub.f32 1.0, %v1678_v27  ;;  %v1122_v57 = vmul.f32 %v2216_v37, %v681_v50 }
 0x175   :  { %1699 = vpow2.f32 %v670_v49 }
 0x176   :  { %v1276_v40 = vadd.f32 %v1275_v26, %v1158_v43  ;;  %v1682_v43 = vpop.eup %1681  ;;  %v2205_v26 = vld [vmem:[%s2343_s7 + $0x10] sm:$0xff]  ;;  %v1119_v35 = vmul.f32 %v2200_v0, %v678_v31  ;;  %1701 = vpow2.f32 %v672_v48  ;;  %v2271_v31 = vld [vmem:[%s2343_s7 + $0x60] sm:$0xff] }
 0x177   :  { %v679_v15 = vsub.f32 1.0, %v1682_v43  ;;  %v1684_v29 = vpop.eup %1683  ;;  %v1121_v32 = vmul.f32 %v2205_v26, %v680_v34  ;;  %1703 = vpow2.f32 %v674_v28 }
 0x178   :  { %1277 = vst [vmem:[#allocation8] sm:$0x1] %v1276_v40  ;;  %v2210_v40 = vld [vmem:[%s2343_s7 + $0x8] sm:$0xff]  ;;  %v1686_v58 = vpop.eup %1685  ;;  %v682_v52 = vsub.f32 1.0, %v1684_v29  ;;  %1705 = vpow2.f32 %v676_v44 }
 0x179   :  { %v1120_v10 = vmul.f32 %v2210_v40, %v679_v15  ;;  %v1688_v16 = vpop.eup %1687  ;;  %v684_v62 = vsub.f32 1.0, %v1686_v58 }
 0x17a   :  { %v683_v20 = vsub.f32 1.0, %v1688_v16  ;;  %v1690_v1 = vpop.eup %1689  ;;  %v1123_v63 = vmul.f32 %v2223_v54, %v682_v52 }
 0x17b   :  { %v1135_v59 = vadd.f32 %v1120_v10, %v1119_v35  ;;  %v1692_v21 = vpop.eup %1691  ;;  %v685_v6 = vsub.f32 1.0, %v1690_v1  ;;  %v1125_v9 = vmul.f32 %v2235_v55, %v684_v62  ;;  %v2277_v35 = vld [vmem:[%s2343_s7 + $0x68] sm:$0xff]  ;;  %v2289_v10 = vld [vmem:[%s2343_s7 + $0x78] sm:$0xff] }
 0x17c   :  { %v1124_v38 = vmul.f32 %v2229_v24, %v683_v20  ;;  %v1694_v25 = vpop.eup %1693  ;;  %v686_v46 = vsub.f32 1.0, %v1692_v21 }
 0x17d   :  { %v1136_v45 = vadd.f32 %v1135_v59, %v1121_v32  ;;  %v1696_v11 = vpop.eup %1695  ;;  %v1126_v13 = vmul.f32 %v2241_v12, %v685_v6  ;;  %v687_v61 = vsub.f32 1.0, %v1694_v25 }
 0x17e   :  { %v1698_v17 = vpop.eup %1697  ;;  %v688_v3 = vsub.f32 1.0, %v1696_v11  ;;  %v1127_v51 = vmul.f32 %v2247_v53, %v686_v46 }
 0x17f   :  { %v1137_v4 = vadd.f32 %v1136_v45, %v1122_v57  ;;  %v1700_v19 = vpop.eup %1699  ;;  %v689_v39 = vsub.f32 1.0, %v1698_v17  ;;  %v1128_v33 = vmul.f32 %v2253_v18, %v687_v61 }
 0x180   :  { %v1702_v27 = vpop.eup %1701  ;;  %v1129_v41 = vmul.f32 %v2259_v56, %v688_v3  ;;  %v690_v5 = vsub.f32 1.0, %v1700_v19 }
 0x181   :  { %v1138_v60 = vadd.f32 %v1137_v4, %v1123_v63  ;;  %v1704_v34 = vpop.eup %1703  ;;  %v1130_v43 = vmul.f32 %v2265_v30, %v689_v39  ;;  %v691_v42 = vsub.f32 1.0, %v1702_v27  ;;  %v1118_v63 = vld [vmem:[#allocation7] sm:$0x1] }
 0x182   :  { %v1706_v47 = vpop.eup %1705  ;;  %v692_v15 = vsub.f32 1.0, %v1704_v34  ;;  %v1131_v29 = vmul.f32 %v2271_v31, %v690_v5 }
 0x183   :  { %v1139_v14 = vadd.f32 %v1138_v60, %v1124_v38  ;;  %v693_v58 = vsub.f32 1.0, %v1706_v47  ;;  %v1132_v32 = vmul.f32 %v2277_v35, %v691_v42 }
 0x184   :  { %v1133_v52 = vmul.f32 %v2283_v36, %v692_v15 }
 0x185   :  { %v1140_v8 = vadd.f32 %v1139_v14, %v1125_v9  ;;  %v1134_v7 = vmul.f32 %v2289_v10, %v693_v58 }
 0x187   :  { %v1141_v22 = vadd.f32 %v1140_v8, %v1126_v13 }
 0x189   :  { %v1142_v23 = vadd.f32 %v1141_v22, %v1127_v51 }
 0x18b   :  { %v1143_v2 = vadd.f32 %v1142_v23, %v1128_v33 }
 0x18d   :  { %v1144_v50 = vadd.f32 %v1143_v2, %v1129_v41 }
 0x18f   :  { %v1145_v49 = vadd.f32 %v1144_v50, %v1130_v43 }
 0x191   :  { %v1146_v16 = vadd.f32 %v1145_v49, %v1131_v29  ;;  %v2297_v49 = vld [vmem:[%s2341_s5] ss:$0 sm:$0xff] }
 0x193   :  { %v1147_v48 = vadd.f32 %v1146_v16, %v1132_v32 }
 0x195   :  { %v1148_v57 = vadd.f32 %v1147_v48, %v1133_v52 }
 0x197   :  { %v1149_v59 = vadd.f32 %v1148_v57, %v1134_v7 }
 0x199   :  { %v1150_v20 = vrot.slane %v1149_v59, 4 }
 0x19b   :  { %v1151_v1 = vadd.f32 %v1150_v20, %v1149_v59 }
 0x19d   :  { %v1152_v28 = vrot.slane %v1151_v1, 2 }
 0x19f   :  { %v1153_v45 = vadd.f32 %v1152_v28, %v1151_v1 }
 0x1a1   :  { %v1154_v62 = vrot.slane %v1153_v45, 1 }
 0x1a3   :  { %v1155_v21 = vadd.f32 %v1154_v62, %v1153_v45 }
 0x1a5   :  { %v1156_v44 = vadd.f32 %v1155_v21, %v1118_v63 }
 0x1a7   :  { %1157 = vst [vmem:[#allocation7] sm:$0x1] %v1156_v44 }
 0x1ae   :  { %v1299_v4 = vld [vmem:[#allocation7] sm:$0x1] }
 0x1af   :  { %v1300_v6 = vsel %vm1285_vm0, %v1299_v4, 0.0 }
 0x1b0   :  { %1301 = vadd.xlane.f32.xlu1 %v1300_v6 }
 0x1d2   :  { %v738_v47 = vpop.xlane.xlu1 %737 }
 0x1d3   :  { %v1000_v59 = vadd.f32 %v2297_v49, %v738_v47 }
 0x1d8   :  { %v734_v42 = vpop.xlane.xlu0 %733 }
 0x1d9   :  { %v998_v16 = vadd.f32 %v2297_v49, %v734_v42 }
 0x1dc   :  { %v740_v15 = vpop.xlane.xlu1 %739 }
 0x1dd   :  { %v1001_v21 = vadd.f32 %v2297_v49, %v740_v15 }
 0x1de   :  { %v736_v50 = vpop.xlane.xlu0 %735 }
 0x1df   :  { %v999_v1 = vadd.f32 %v2297_v49, %v736_v50 }
 0x1e2   :  { %v742_v29 = vpop.xlane.xlu0 %741 }
 0x1e3   :  { %v744_v58 = vpop.xlane.xlu1 %743 }
 0x1e6   :  { %v746_v28 = vpop.xlane.xlu0 %745 }
 0x1e7   :  { %v748_v44 = vpop.xlane.xlu1 %747 }
 0x21b   :  { %v1558_v38 = vpop.f32.mrb[16].mxu0 }
 0x21c   :  { %v815_v25 = vpop.f32.mrb[17].mxu0 }
 0x21d   :  { %v1559_v9 = vpop.f32.mrb[18].mxu0 }
 0x21e   :  { %v879_v60 = vpack.c.bf16 %v1559_v9, %v1558_v38  ;;  %v818_v46 = vpop.f32.mrb[19].mxu0 }
 0x21f   :  { %v878_v11 = vpack.c.bf16 %v818_v46, %v815_v25 }
 0x221   :  { %1588 = vmatprep.mubr.bf16.mxu1 %v878_v11 }
 0x222   :  { %1589 = vmatmul.mubr.bf16.vlgmr.msra.gmra.mrb[16].mxu1 %v879_v60  ;;  %v750_v60 = vpop.xlane.xlu0 %749 }
 0x226   :  { %v1562_v13 = vpop.f32.mrb[20].mxu0 }
 0x227   :  { %v831_v14 = vpop.f32.mrb[21].mxu0 }
 0x228   :  { %v1563_v61 = vpop.f32.mrb[22].mxu0 }
 0x229   :  { %v881_v17 = vpack.c.bf16 %v1563_v61, %v1562_v13  ;;  %v834_v8 = vpop.f32.mrb[23].mxu0  ;;  %v752_v13 = vpop.xlane.xlu1 %751 }
 0x22a   :  { %v880_v3 = vpack.c.bf16 %v834_v8, %v831_v14 }
 0x22c   :  { %1592 = vmatprep.mubr.bf16.mxu1 %v880_v3  ;;  %v1002_v3 = vadd.f32 %v2297_v49, %v742_v29  ;;  %v1006_v29 = vadd.f32 %v2297_v49, %v750_v60 }
 0x22d   :  { %1593 = vmatmul.mubr.bf16.gmra.mrb[20].mxu1 %v881_v17 }
 0x22e   :  { %v1566_v51 = vpop.f32.mrb[24].mxu0 }
 0x22f   :  { %v847_v19 = vpop.f32.mrb[25].mxu0 }
 0x230   :  { %v1567_v22 = vpop.f32.mrb[26].mxu0 }
 0x231   :  { %v883_v39 = vpack.c.bf16 %v1567_v22, %v1566_v51  ;;  %v850_v33 = vpop.f32.mrb[27].mxu0 }
 0x232   :  { %v882_v27 = vpack.c.bf16 %v850_v33, %v847_v19 }
 0x234   :  { %1596 = vmatprep.mubr.bf16.mxu1 %v882_v27  ;;  %v754_v27 = vpop.xlane.xlu0 %753 }
 0x235   :  { %1597 = vmatmul.mubr.bf16.gmra.mrb[24].mxu1 %v883_v39 }
 0x236   :  { %v1570_v41 = vpop.f32.mrb[28].mxu0 }
 0x237   :  { %v863_v23 = vpop.f32.mrb[29].mxu0 }
 0x238   :  { %v1571_v5 = vpop.f32.mrb[30].mxu0 }
 0x239   :  { %v885_v34 = vpack.c.bf16 %v1571_v5, %v1570_v41  ;;  %v866_v43 = vpop.f32.mrb[31].mxu0  ;;  %v756_v5 = vpop.xlane.xlu1 %755 }
 0x23a   :  { %v884_v2 = vpack.c.bf16 %v866_v43, %v863_v23 }
 0x23c   :  { %1600 = vmatprep.mubr.bf16.mxu1 %v884_v2 }
 0x23d   :  { %1601 = vmatmul.mubr.bf16.gmra.mrb[28].mxu1 %v885_v34 }
 0x2f5   :  { %v1590_v32 = vpop.f32.mrb[16].mxu1 }
 0x2f6   :  { %v928_v52 = vpop.f32.mrb[17].mxu1  ;;  %v1016_v7 = vmul.f32 2.0, %v1590_v32  ;;  %v758_v32 = vpop.xlane.xlu0 %757 }
 0x2f7   :  { %v1014_v48 = vmul.f32 2.0, %v928_v52  ;;  %v1591_v57 = vpop.f32.mrb[18].mxu1 }
 0x2f8   :  { %v931_v20 = vpop.f32.mrb[19].mxu1  ;;  %v1017_v62 = vmul.f32 2.0, %v1591_v57  ;;  %v1032_v4 = vsub.f32 %v1000_v59, %v1016_v7  ;;  %v1007_v59 = vadd.f32 %v2297_v49, %v752_v13 }
 0x2f9   :  { %v1030_v45 = vsub.f32 %v998_v16, %v1014_v48  ;;  %v1015_v63 = vmul.f32 2.0, %v931_v20 }
 0x2fa   :  { %v1033_v25 = vsub.f32 %v1001_v21, %v1017_v62  ;;  %v1081_v46 = vmul.f32 %v2205_v26, %v1032_v4  ;;  %v1009_v21 = vadd.f32 %v2297_v49, %v756_v5 }
 0x2fb   :  { %v1031_v6 = vsub.f32 %v999_v1, %v1015_v63  ;;  %v1079_v38 = vmul.f32 %v2200_v0, %v1030_v45  ;;  %v1003_v0 = vadd.f32 %v2297_v49, %v744_v58 }
 0x2fc   :  { %v1082_v14 = vmul.f32 %v2216_v37, %v1033_v25  ;;  %v1005_v37 = vadd.f32 %v2297_v49, %v748_v44  ;;  %v762_v25 = vpop.xlane.xlu0 %761 }
 0x2fd   :  { %v1080_v9 = vmul.f32 %v2210_v40, %v1031_v6  ;;  %v1004_v40 = vadd.f32 %v2297_v49, %v746_v28  ;;  %v760_v28 = vpop.xlane.xlu1 %759 }
 0x2ff   :  { %v1095_v11 = vadd.f32 %v1080_v9, %v1079_v38 }
 0x300   :  { %v1594_v17 = vpop.f32.mrb[20].mxu1 }
 0x301   :  { %v1096_v61 = vadd.f32 %v1095_v11, %v1081_v46  ;;  %v944_v8 = vpop.f32.mrb[21].mxu1  ;;  %v1020_v51 = vmul.f32 2.0, %v1594_v17  ;;  %v1010_v11 = vadd.f32 %v2297_v49, %v758_v32 }
 0x302   :  { %v1018_v19 = vmul.f32 2.0, %v944_v8  ;;  %v1595_v39 = vpop.f32.mrb[22].mxu1 }
 0x303   :  { %v1097_v22 = vadd.f32 %v1096_v61, %v1082_v14  ;;  %v947_v33 = vpop.f32.mrb[23].mxu1  ;;  %v1021_v41 = vmul.f32 2.0, %v1595_v39  ;;  %v1036_v34 = vsub.f32 %v1004_v40, %v1020_v51  ;;  %v1012_v51 = vadd.f32 %v2297_v49, %v762_v25 }
 0x304   :  { %v1034_v26 = vsub.f32 %v1002_v3, %v1018_v19  ;;  %v1019_v23 = vmul.f32 2.0, %v947_v33 }
 0x305   :  { %v1037_v47 = vsub.f32 %v1005_v37, %v1021_v41  ;;  %v1085_v52 = vmul.f32 %v2235_v55, %v1036_v34 }
 0x306   :  { %v1083_v43 = vmul.f32 %v2223_v54, %v1034_v26  ;;  %v1035_v2 = vsub.f32 %v1003_v0, %v1019_v23  ;;  %v1008_v54 = vadd.f32 %v2297_v49, %v754_v27 }
 0x308   :  { %v1098_v42 = vadd.f32 %v1097_v22, %v1083_v43  ;;  %v1084_v50 = vmul.f32 %v2229_v24, %v1035_v2  ;;  %v1598_v15 = vpop.f32.mrb[24].mxu1  ;;  %v1086_v24 = vmul.f32 %v2241_v12, %v1037_v47  ;;  %v764_v12 = vpop.xlane.xlu1 %763 }
 0x309   :  { %v960_v58 = vpop.f32.mrb[25].mxu1  ;;  %v1024_v7 = vmul.f32 2.0, %v1598_v15  ;;  %v1013_v40 = vadd.f32 %v2297_v49, %v764_v12 }
 0x30a   :  { %v1099_v16 = vadd.f32 %v1098_v42, %v1084_v50  ;;  %v1022_v48 = vmul.f32 2.0, %v960_v58  ;;  %v1599_v57 = vpop.f32.mrb[26].mxu1  ;;  %v1078_v58 = vld [vmem:[#allocation6] sm:$0x1] }
 0x30b   :  { %v1025_v20 = vmul.f32 2.0, %v1599_v57  ;;  %v963_v1 = vpop.f32.mrb[27].mxu1  ;;  %v1040_v44 = vsub.f32 %v1008_v54, %v1024_v7 }
 0x30c   :  { %v1100_v45 = vadd.f32 %v1099_v16, %v1085_v52  ;;  %v1038_v62 = vsub.f32 %v1006_v29, %v1022_v48  ;;  %v1023_v63 = vmul.f32 2.0, %v963_v1 }
 0x30d   :  { %v1041_v38 = vsub.f32 %v1009_v21, %v1025_v20  ;;  %v1089_v14 = vmul.f32 %v2259_v56, %v1040_v44 }
 0x30e   :  { %v1087_v55 = vmul.f32 %v2247_v53, %v1038_v62  ;;  %v1101_v4 = vadd.f32 %v1100_v45, %v1086_v24  ;;  %v1039_v6 = vsub.f32 %v1007_v59, %v1023_v63  ;;  %v1011_v53 = vadd.f32 %v2297_v49, %v760_v28 }
 0x30f   :  { %v1090_v19 = vmul.f32 %v2265_v30, %v1041_v38 }
 0x310   :  { %v1102_v9 = vadd.f32 %v1101_v4, %v1087_v55  ;;  %v1088_v60 = vmul.f32 %v2253_v18, %v1039_v6  ;;  %v1602_v46 = vpop.f32.mrb[28].mxu1 }
 0x311   :  { %v976_v13 = vpop.f32.mrb[29].mxu1  ;;  %v1028_v17 = vmul.f32 2.0, %v1602_v46 }
 0x312   :  { %v1103_v61 = vadd.f32 %v1102_v9, %v1088_v60  ;;  %v1026_v8 = vmul.f32 2.0, %v976_v13  ;;  %v1603_v3 = vpop.f32.mrb[30].mxu1  ;;  %v1281_v60 = vlaneseq }
 0x313   :  { %v979_v22 = vpop.f32.mrb[31].mxu1  ;;  %v1029_v0 = vmul.f32 2.0, %v1603_v3  ;;  %v1044_v27 = vsub.f32 %v1012_v51, %v1028_v17 }
 0x314   :  { %v1104_v39 = vadd.f32 %v1103_v61, %v1089_v14  ;;  %v1042_v18 = vsub.f32 %v1010_v11, %v1026_v8  ;;  %v1027_v33 = vmul.f32 2.0, %v979_v22  ;;  %v1282_v46 = vand.u32 127, %v1281_v60 }
 0x315   :  { %v1045_v37 = vsub.f32 %v1013_v40, %v1029_v0  ;;  %v1093_v34 = vmul.f32 %v2283_v36, %v1044_v27 }
 0x316   :  { %v1091_v56 = vmul.f32 %v2271_v31, %v1042_v18  ;;  %v1105_v26 = vadd.f32 %v1104_v39, %v1090_v19  ;;  %v1043_v41 = vsub.f32 %v1011_v53, %v1027_v33  ;;  %vm1283_vm1 = vcmp.eq.s32.totalorder %v1282_v46, 0 }
 0x317   :  { %v1094_v30 = vmul.f32 %v2289_v10, %v1045_v37  ;;  %v1302_v10 = vpop.xlane.xlu1 %1301  ;;  %vm1298_vm2 = vcmp.eq.s32.totalorder %v1282_v46, 1  ;;  %vm1313_vm3 = vcmp.eq.s32.totalorder %v1282_v46, 2 }
 0x318   :  { %v1106_v23 = vadd.f32 %v1105_v26, %v1091_v56  ;;  %v1092_v5 = vmul.f32 %v2277_v35, %v1043_v41  ;;  %v1314_v35 = vld [vmem:[#allocation8] sm:$0x1]  ;;  %v1303_v7 = vrot.slane %v1302_v10, 4 }
 0x319   :  { %v1315_v36 = vsel %vm1285_vm0, %v1314_v35, 0.0 }
 0x31a   :  { %v1107_v43 = vadd.f32 %v1106_v23, %v1092_v5  ;;  %v1304_v48 = vadd.f32 %v1303_v7, %v1302_v10 }
 0x31c   :  { %v1108_v2 = vadd.f32 %v1107_v43, %v1093_v34  ;;  %v1305_v57 = vrot.slane %v1304_v48, 2 }
 0x31e   :  { %v1109_v42 = vadd.f32 %v1108_v2, %v1094_v30  ;;  %v1306_v1 = vadd.f32 %v1305_v57, %v1304_v48 }
 0x320   :  { %v1110_v47 = vrot.slane %v1109_v42, 4  ;;  %v1307_v21 = vrot.slane %v1306_v1, 1 }
 0x322   :  { %v1111_v50 = vadd.f32 %v1110_v47, %v1109_v42  ;;  %v1308_v38 = vadd.f32 %v1307_v21, %v1306_v1 }
 0x324   :  { %v1112_v15 = vrot.slane %v1111_v50, 2 }
 0x326   :  { %v1113_v49 = vadd.f32 %v1112_v15, %v1111_v50 }
 0x328   :  { %v1114_v29 = vrot.slane %v1113_v49, 1 }
 0x32a   :  { %v1115_v31 = vadd.f32 %v1114_v29, %v1113_v49 }
 0x32c   :  { %v1116_v32 = vadd.f32 %v1115_v31, %v1078_v58 }
 0x32e   :  { %1117 = vst [vmem:[#allocation6] sm:$0x1] %v1116_v32 }
 0x335   :  { %v1284_v52 = vld [vmem:[#allocation6] sm:$0x1] }
 0x336   :  { %v1286_v16 = vsel %vm1285_vm0, %v1284_v52, 0.0 }
 0x337   :  { %1287 = vadd.xlane.f32.xlu0 %v1286_v16 }
 0x33b   :  { %1316 = vadd.xlane.f32.xlu0 %v1315_v36 }
 0x3c4   :  { %v1288_v59 = vpop.xlane.xlu0 %1287 }
 0x3c5   :  { %v1289_v54 = vrot.slane %v1288_v59, 4 }
 0x3c7   :  { %v1290_v20 = vadd.f32 %v1289_v54, %v1288_v59 }
 0x3c8   :  { %v1317_v28 = vpop.xlane.xlu0 %1316 }
 0x3c9   :  { %v1291_v24 = vrot.slane %v1290_v20, 2  ;;  %v1318_v45 = vrot.slane %v1317_v28, 4 }
 0x3cb   :  { %v1319_v62 = vadd.f32 %v1318_v45, %v1317_v28  ;;  %v1292_v63 = vadd.f32 %v1291_v24, %v1290_v20 }
 0x3cd   :  { %v1320_v44 = vrot.slane %v1319_v62, 2  ;;  %v1293_v55 = vrot.slane %v1292_v63, 1 }
 0x3cf   :  { %v1321_v4 = vadd.f32 %v1320_v44, %v1319_v62  ;;  %v1294_v6 = vadd.f32 %v1293_v55, %v1292_v63 }
 0x3d1   :  { %1604 = vpush %v1294_v6  ;;  %v1322_v25 = vrot.slane %v1321_v4, 1 }
 0x3d2   :  { %1606 = vpush %v1308_v38 }
 0x3d3   :  { %v1323_v9 = vadd.f32 %v1322_v25, %v1321_v4 }
 0x3d5   :  { %1608 = vpush %v1323_v9 }
 0x402   :  { %s1605_s5 = spop %1604 }
 0x403   :  { %v1296_v11 = vstv %s1605_s5  ;;  %s1607_s0 = spop %1606 }
 0x404   :  { %v1297_v13 = vsel %vm1283_vm1, %v1296_v11, 0.0  ;;  %v1310_v12 = vstv %s1607_s0 }
 0x405   :  { %v1311_v14 = vsel %vm1298_vm2, %v1310_v12, 0.0 }
 0x406   :  { %s1609_s30 = spop %1608  ;;  %v1312_v61 = vadd.f32 %v1311_v14, %v1297_v13 }
 0x407   :  { %v1325_v17 = vstv %s1609_s30 }
 0x408   :  { %v1326_v8 = vsel %vm1313_vm3, %v1325_v17, 0.0 }
 0x409   :  { %v1327_v3 = vadd.f32 %v1326_v8, %v1312_v61 }
 0x40b   :  { %1328 = vst [vmem:[%s2344_s8] sm:$0xff] %v1327_v3 }
 0x40c   :  { %1333 = vsyncmov [#allocation9] }
 0x40f   :  { %s1334_s11 = vpop.sfrf %1333 }
 0x410   :  { %p1408_p0 = scmp.ne.s32.totalorder %s1334_s11, 0 }
 0x412   :  { %1338 = shalt.err (%p1408_p0)  }
 0x413   :  { %1340 = vsyncmov [#allocation9 + $0x1] }
 0x416   :  { %s1341_s12 = vpop.sfrf %1340 }
 0x417   :  { %p1409_p1 = scmp.ne.s32.totalorder %s1341_s12, 0 }
 0x419   :  { %1345 = shalt.err (%p1409_p1)  }
 0x41a   :  { %1347 = vsyncmov [#allocation9 + $0x2] }
 0x41d   :  { %s1348_s13 = vpop.sfrf %1347 }
 0x41e   :  { %p1410_p2 = scmp.ne.s32.totalorder %s1348_s13, 0 }
 0x420   :  { %1352 = shalt.err (%p1410_p2)  }
 0x421   :  { %1354 = vsyncmov [#allocation9 + $0x3] }
 0x424   :  { %s1355_s2 = vpop.sfrf %1354 }
 0x425   :  { %p1411_p3 = scmp.ne.s32.totalorder %s1355_s2, 0 }
 0x427   :  { %1359 = shalt.err (%p1411_p3)  }

</bundles_post_ra>
